<compile_context>
chip_gen: v5e
topology: v5e:2x2
jax: 0.10.0
libtpu: 0.0.40
codegen_flags: <defaults>
</compile_context>

<pallas_src>
import math

import jax
import jax.numpy as jnp
from jax.experimental import pallas as pl
from jax.experimental.pallas import tpu as pltpu


# ---------------------------------------------------------------------------
# Fused Pallas kernel: conv3x3+ReLU -> FC(latent) -> FC + sigmoid, TB images/step
# ---------------------------------------------------------------------------
def _make_fused_kernel(sigmoid_factor, tile_b, cmid, latent):
    def kernel(xcol_ref, wconv_ref, bconv_ref, wenc_ref, benc_ref,
               wdec_ref, bdec_ref, o_ref, h_s):
        # ---- per-image 3x3 conv as one K = 9*Cin matmul + bias + ReLU --------
        # Results go to a bf16 VMEM scratch (TB, Cmid, HW) with contiguous stores.
        for t in range(tile_b):                               # unrolled (TB=8)
            h = jnp.dot(wconv_ref[...], xcol_ref[t],
                        preferred_element_type=jnp.float32)   # (Cmid, HW) f32
            h = jnp.maximum(h + bconv_ref[...], 0.0)          # bias + ReLU (f32)
            h_s[t] = h.astype(h_s.dtype)

        # ---- encoder FC, batched over the image tile (M = TB) ----------------
        # NCHW flatten is baked into the wenc layout (Cmid, HW, latent); the
        # strided slice h_s[:, c, :] gives the (TB, HW) operand with no relayout.
        acc = jnp.zeros((tile_b, latent), jnp.float32)
        for c in range(cmid):                                 # unrolled (Cmid=8)
            acc = acc + jnp.dot(h_s[:, c, :], wenc_ref[c],
                                preferred_element_type=jnp.float32)
        z = acc + benc_ref[...]                               # (TB, latent) f32

        # ---- decoder FC + sigmoid(sigmoid_factor * x), batched ---------------
        y = jnp.dot(z.astype(wdec_ref.dtype), wdec_ref[...],
                    preferred_element_type=jnp.float32) + bdec_ref[...]
        o_ref[...] = jax.nn.sigmoid(sigmoid_factor * y).astype(o_ref.dtype)

    return kernel


def fused_spacial_decoder(x_colT, w_convT, b_conv, w_enc3, b_enc, w_dec, b_dec,
                          sigmoid_factor, tile_b=8):
    """x_colT: (NB, 9*Cin, H*W) bf16 im2col slab.  Returns (NB, C*H*W) f32."""
    NB, KC, HW = x_colT.shape
    Cmid = w_convT.shape[0]
    latent = w_dec.shape[0]
    CHW = w_dec.shape[1]

    # Pad the image count to a multiple of the tile so the grid divides evenly.
    nb_pad = pl.cdiv(NB, tile_b) * tile_b
    if nb_pad != NB:
        x_colT = jnp.pad(x_colT, ((0, nb_pad - NB), (0, 0), (0, 0)))
    ngrid = nb_pad // tile_b

    out = pl.pallas_call(
        _make_fused_kernel(float(sigmoid_factor), tile_b, Cmid, latent),
        out_shape=jax.ShapeDtypeStruct((nb_pad, CHW), jnp.float32),
        grid=(ngrid,),
        in_specs=[
            pl.BlockSpec((tile_b, KC, HW), lambda n: (n, 0, 0)),    # im2col tile
            pl.BlockSpec((Cmid, KC), lambda n: (0, 0)),             # conv weight
            pl.BlockSpec((Cmid, 1), lambda n: (0, 0)),              # conv bias
            pl.BlockSpec((Cmid, HW, latent), lambda n: (0, 0, 0)),  # enc FC w
            pl.BlockSpec((1, latent), lambda n: (0, 0)),            # enc FC b
            pl.BlockSpec((latent, CHW), lambda n: (0, 0)),          # dec FC w
            pl.BlockSpec((1, CHW), lambda n: (0, 0)),               # dec FC b
        ],
        out_specs=pl.BlockSpec((tile_b, CHW), lambda n: (n, 0)),    # (8,1024) dense
        scratch_shapes=[pltpu.VMEM((tile_b, Cmid, HW), jnp.bfloat16)],
        compiler_params=pltpu.CompilerParams(
            dimension_semantics=("parallel",)),                     # v7x: 2 TCs
    )(x_colT, w_convT, b_conv, w_enc3, b_enc, w_dec, b_dec)
    return out[:NB]


# ---------------------------------------------------------------------------
# SpacialDecoder (JAX/Pallas version of the PyTorch module)
# ---------------------------------------------------------------------------
class SpacialDecoderPallas:
    # TODO(synk): exact CNNEncoder / CNNDecoder architectures, torch.load of
    # pretrained weights and requires_grad fixing have no kernel-level
    # equivalent; a representative conv encoder / linear decoder with
    # deterministic synthetic weights is used instead.
    def __init__(self, config, key, hidden_channels=8, latent_dim=32):
        self.config = config
        self.input_type = config.get("input_type", "bev")
        self.output_type = config.get("output_type", "bev")
        self.max_vehicles = config.get("max_vehicles")
        self.image_size = config.get("image_size")           # (C, H, W)
        self.sigmoid_factor = float(config.get("sigmoid_factor", 1.0))

        c, h, w = self.image_size
        cmid = hidden_channels
        k1, k2, k3 = jax.random.split(key, 3)
        conv_w = 0.1 * jax.random.normal(k1, (3, 3, c, cmid), jnp.float32)
        conv_b = jnp.zeros((cmid,), jnp.float32)
        enc_fc_w = jax.random.normal(
            k2, (cmid * h * w, latent_dim), jnp.float32) / math.sqrt(cmid * h * w)
        enc_fc_b = jnp.zeros((latent_dim,), jnp.float32)
        dec_fc_w = jax.random.normal(
            k3, (latent_dim, c * h * w), jnp.float32) / math.sqrt(latent_dim)
        dec_fc_b = jnp.zeros((c * h * w,), jnp.float32)
        self.params_f32 = dict(conv_w=conv_w, conv_b=conv_b,
                               enc_fc_w=enc_fc_w, enc_fc_b=enc_fc_b,
                               dec_fc_w=dec_fc_w, dec_fc_b=dec_fc_b)

        # Kernel-layout parameters, computed ONCE at init:
        #  * conv weight transposed with the 9 taps folded into K,
        #  * encoder FC weight reshaped to (Cmid, H*W, latent): NCHW flatten
        #    baked in, so no transpose between conv and FC inside the kernel,
        #  * matmul operands in bf16, biases in f32.
        self.kparams = dict(
            w_convT=conv_w.reshape(9 * c, cmid).T.astype(jnp.bfloat16),
            b_conv=conv_b.reshape(cmid, 1),
            w_enc3=enc_fc_w.reshape(cmid, h * w, latent_dim).astype(jnp.bfloat16),
            b_enc=enc_fc_b.reshape(1, latent_dim),
            w_dec=dec_fc_w.astype(jnp.bfloat16),
            b_dec=dec_fc_b.reshape(1, c * h * w),
        )

    def _im2col_transposed(self, x_nchw):
        """(NB, Cin, H, W) -> (NB, 9*Cin, H*W) bf16 single im2col slab."""
        NB, Cin, H, W = x_nchw.shape
        x_nhwc = jnp.transpose(x_nchw, (0, 2, 3, 1))
        xp = jnp.pad(x_nhwc, ((0, 0), (1, 1), (1, 1), (0, 0)))
        taps = jnp.stack(
            [xp[:, ky:ky + H, kx:kx + W, :] for ky in range(3) for kx in range(3)],
            axis=3)                                          # (NB, H, W, 9, Cin)
        col = taps.reshape(NB, H * W, 9 * Cin)               # K = tap*Cin + cin
        return jnp.transpose(col, (0, 2, 1)).astype(jnp.bfloat16)

    def _reshape_output(self, x):
        batch_size = x.shape[0]
        if self.output_type == "bev":
            channels, height, width = self.image_size
            x = x.reshape(batch_size, channels, height, width)
        elif self.output_type == "raw":
            x = x.reshape(batch_size, self.max_vehicles, -1)
        return x

    def __call__(self, x, batch_first=True):
        if batch_first:
            x = jnp.swapaxes(x, 0, 1)                        # torch transpose(0,1)
        if self.input_type != "bev":
            raise NotImplementedError("Only the 'bev' CNN encoder path is implemented.")
        seq_len, batch_size, channels, height, width = x.shape
        x_img = x.reshape(seq_len * batch_size, channels, height, width)

        kp = self.kparams
        flat = fused_spacial_decoder(
            self._im2col_transposed(x_img),
            kp["w_convT"], kp["b_conv"], kp["w_enc3"], kp["b_enc"],
            kp["w_dec"], kp["b_dec"], self.sigmoid_factor)   # (seq*batch, C*H*W)

        # torch: reshape(seq, batch, -1) -> squeeze(dim=0) -> decoder ->
        # _reshape_output.  The linear decoder acts row-wise, so for every case
        # in which the PyTorch reshape is well-defined (seq_len == 1, or
        # batch == 1) this equals reshaping the fused row-wise result.
        return self._reshape_output(flat)


# ---------------------------------------------------------------------------
def _reference_forward(model, x, batch_first=True):
    """Pure-JAX f32 reference of the same forward (sanity check only)."""
    if batch_first:
        x = jnp.swapaxes(x, 0, 1)
    seq_len, batch_size, C, H, W = x.shape
    xi = x.reshape(seq_len * batch_size, C, H, W)
    p = model.params_f32
    xn = jnp.transpose(xi, (0, 2, 3, 1))
    xp = jnp.pad(xn, ((0, 0), (1, 1), (1, 1), (0, 0)))
    taps = jnp.stack([xp[:, ky:ky + H, kx:kx + W, :]
                      for ky in range(3) for kx in range(3)], axis=3)
    col = taps.reshape(xi.shape[0], H * W, 9 * C)
    h = jnp.maximum(jnp.einsum("npk,kc->npc", col,
                               p["conv_w"].reshape(9 * C, -1)) + p["conv_b"], 0.0)
    h_flat = jnp.transpose(h, (0, 2, 1)).reshape(xi.shape[0], -1)   # NCHW flatten
    z = h_flat @ p["enc_fc_w"] + p["enc_fc_b"]
    y = jax.nn.sigmoid(model.sigmoid_factor * (z @ p["dec_fc_w"] + p["dec_fc_b"]))
    return model._reshape_output(y)


if __name__ == "__main__":
    config = {
        "input_type": "bev",
        "output_type": "bev",
        "image_size": (4, 16, 16),
        "sigmoid_factor": 1.0,
        "encoder": "CNN_Encoder",
        "decoder": "CNN_Decoder",
        "temporal": None,
        "max_vehicles": None,
    }

    key = jax.random.PRNGKey(0)
    k_param, k_data = jax.random.split(key)

    model = SpacialDecoderPallas(config, k_param)

    # (batch=2, seq=1, C=4, H=16, W=16), batch_first=True
    x = jax.random.normal(k_data, (2, 1, 4, 16, 16), dtype=jnp.float32)

    out = jax.block_until_ready(model(x, batch_first=True))
    ref = jax.block_until_ready(_reference_forward(model, x, batch_first=True))

    assert out.shape == (2, 4, 16, 16), out.shape
    assert bool(jnp.all(jnp.isfinite(out)))
    # bf16 MXU operands with f32 accumulation; outputs are in [0, 1].
    max_err = float(jnp.max(jnp.abs(out - ref)))
    assert max_err < 5e-2, max_err
    print("KERNEL_OK")
</pallas_src>

<mosaic_0001>
module attributes {stable_mosaic.version = 11 : i64} {
  func.func @kernel(%arg0: i32, %arg1: memref<8x36x256xbf16, #tpu.memory_space<vmem>>, %arg2: memref<8x36xbf16, #tpu.memory_space<vmem>>, %arg3: memref<8x1xf32, #tpu.memory_space<vmem>>, %arg4: memref<8x256x32xbf16, #tpu.memory_space<vmem>>, %arg5: memref<1x32xf32, #tpu.memory_space<vmem>>, %arg6: memref<32x1024xbf16, #tpu.memory_space<vmem>>, %arg7: memref<1x1024xf32, #tpu.memory_space<vmem>>, %arg8: memref<8x1024xf32, #tpu.memory_space<vmem>>, %arg9: memref<8x8x256xbf16, #tpu.memory_space<vmem>>) attributes {dimension_semantics = [#tpu.dimension_semantics<parallel>], iteration_bounds = array<i64: 1>, scalar_prefetch = 0 : i64, scratch_operands = 1 : i64, tpu.core_type = #tpu.core_type<tc>, window_params = [{transform_indices = @transform_0, window_bounds = array<i64: 8, 36, 256>}, {pipeline_mode = #tpu.pipeline_mode<synchronous>, transform_indices = @transform_1, window_bounds = array<i64: 8, 36>}, {pipeline_mode = #tpu.pipeline_mode<synchronous>, transform_indices = @transform_2, window_bounds = array<i64: 8, 1>}, {pipeline_mode = #tpu.pipeline_mode<synchronous>, transform_indices = @transform_3, window_bounds = array<i64: 8, 256, 32>}, {pipeline_mode = #tpu.pipeline_mode<synchronous>, transform_indices = @transform_4, window_bounds = array<i64: 1, 32>}, {pipeline_mode = #tpu.pipeline_mode<synchronous>, transform_indices = @transform_5, window_bounds = array<i64: 32, 1024>}, {pipeline_mode = #tpu.pipeline_mode<synchronous>, transform_indices = @transform_6, window_bounds = array<i64: 1, 1024>}, {transform_indices = @transform_7, window_bounds = array<i64: 8, 1024>}]} {
    %c0 = arith.constant 0 : index
    %c0_0 = arith.constant 0 : index
    %0 = vector.load %arg2[%c0, %c0_0] : memref<8x36xbf16, #tpu.memory_space<vmem>>, vector<8x36xbf16>
    %c0_1 = arith.constant 0 : index
    %c0_2 = arith.constant 0 : index
    %c0_3 = arith.constant 0 : index
    %1 = vector.load %arg1[%c0_1, %c0_2, %c0_3] : memref<8x36x256xbf16, #tpu.memory_space<vmem>>, vector<1x36x256xbf16>
    %2 = vector.shape_cast %1 : vector<1x36x256xbf16> to vector<36x256xbf16>
    %cst = arith.constant dense<0.000000e+00> : vector<8x256xf32>
    %3 = tpu.matmul %0, %2, %cst {dimension_numbers = #tpu.dot_dimension_numbers<[1], [0], [0], [1], [0, 0, 1, 1], [], []>} : vector<8x36xbf16>, vector<36x256xbf16>, vector<8x256xf32> -> vector<8x256xf32>
    %c0_4 = arith.constant 0 : index
    %c0_5 = arith.constant 0 : index
    %4 = vector.load %arg3[%c0_4, %c0_5] : memref<8x1xf32, #tpu.memory_space<vmem>>, vector<8x1xf32>
    %5 = vector.broadcast %4 : vector<8x1xf32> to vector<8x256xf32>
    %6 = arith.addf %3, %5 : vector<8x256xf32>
    %cst_6 = arith.constant 0.000000e+00 : f32
    %7 = vector.broadcast %cst_6 : f32 to vector<8x256xf32>
    %8 = arith.maximumf %6, %7 : vector<8x256xf32>
    %9 = arith.truncf %8 : vector<8x256xf32> to vector<8x256xbf16>
    %c0_7 = arith.constant 0 : index
    %c0_8 = arith.constant 0 : index
    %c0_9 = arith.constant 0 : index
    %10 = vector.load %arg9[%c0_7, %c0_8, %c0_9] : memref<8x8x256xbf16, #tpu.memory_space<vmem>>, vector<1x8x256xbf16>
    %11 = vector.shape_cast %10 : vector<1x8x256xbf16> to vector<8x256xbf16>
    %12 = vector.shape_cast %9 : vector<8x256xbf16> to vector<1x8x256xbf16>
    tpu.vector_store %arg9[%c0_7, %c0_8, %c0_9], %12 {strides = array<i32>} : memref<8x8x256xbf16, #tpu.memory_space<vmem>>, vector<1x8x256xbf16>,
    %c0_10 = arith.constant 0 : index
    %c0_11 = arith.constant 0 : index
    %13 = vector.load %arg2[%c0_10, %c0_11] : memref<8x36xbf16, #tpu.memory_space<vmem>>, vector<8x36xbf16>
    %c1 = arith.constant 1 : index
    %c0_12 = arith.constant 0 : index
    %c0_13 = arith.constant 0 : index
    %14 = vector.load %arg1[%c1, %c0_12, %c0_13] : memref<8x36x256xbf16, #tpu.memory_space<vmem>>, vector<1x36x256xbf16>
    %15 = vector.shape_cast %14 : vector<1x36x256xbf16> to vector<36x256xbf16>
    %cst_14 = arith.constant dense<0.000000e+00> : vector<8x256xf32>
    %16 = tpu.matmul %13, %15, %cst_14 {dimension_numbers = #tpu.dot_dimension_numbers<[1], [0], [0], [1], [0, 0, 1, 1], [], []>} : vector<8x36xbf16>, vector<36x256xbf16>, vector<8x256xf32> -> vector<8x256xf32>
    %c0_15 = arith.constant 0 : index
    %c0_16 = arith.constant 0 : index
    %17 = vector.load %arg3[%c0_15, %c0_16] : memref<8x1xf32, #tpu.memory_space<vmem>>, vector<8x1xf32>
    %18 = vector.broadcast %17 : vector<8x1xf32> to vector<8x256xf32>
    %19 = arith.addf %16, %18 : vector<8x256xf32>
    %cst_17 = arith.constant 0.000000e+00 : f32
    %20 = vector.broadcast %cst_17 : f32 to vector<8x256xf32>
    %21 = arith.maximumf %19, %20 : vector<8x256xf32>
    %22 = arith.truncf %21 : vector<8x256xf32> to vector<8x256xbf16>
    %c1_18 = arith.constant 1 : index
    %c0_19 = arith.constant 0 : index
    %c0_20 = arith.constant 0 : index
    %23 = vector.load %arg9[%c1_18, %c0_19, %c0_20] : memref<8x8x256xbf16, #tpu.memory_space<vmem>>, vector<1x8x256xbf16>
    %24 = vector.shape_cast %23 : vector<1x8x256xbf16> to vector<8x256xbf16>
    %25 = vector.shape_cast %22 : vector<8x256xbf16> to vector<1x8x256xbf16>
    tpu.vector_store %arg9[%c1_18, %c0_19, %c0_20], %25 {strides = array<i32>} : memref<8x8x256xbf16, #tpu.memory_space<vmem>>, vector<1x8x256xbf16>,
    %c0_21 = arith.constant 0 : index
    %c0_22 = arith.constant 0 : index
    %26 = vector.load %arg2[%c0_21, %c0_22] : memref<8x36xbf16, #tpu.memory_space<vmem>>, vector<8x36xbf16>
    %c2 = arith.constant 2 : index
    %c0_23 = arith.constant 0 : index
    %c0_24 = arith.constant 0 : index
    %27 = vector.load %arg1[%c2, %c0_23, %c0_24] : memref<8x36x256xbf16, #tpu.memory_space<vmem>>, vector<1x36x256xbf16>
    %28 = vector.shape_cast %27 : vector<1x36x256xbf16> to vector<36x256xbf16>
    %cst_25 = arith.constant dense<0.000000e+00> : vector<8x256xf32>
    %29 = tpu.matmul %26, %28, %cst_25 {dimension_numbers = #tpu.dot_dimension_numbers<[1], [0], [0], [1], [0, 0, 1, 1], [], []>} : vector<8x36xbf16>, vector<36x256xbf16>, vector<8x256xf32> -> vector<8x256xf32>
    %c0_26 = arith.constant 0 : index
    %c0_27 = arith.constant 0 : index
    %30 = vector.load %arg3[%c0_26, %c0_27] : memref<8x1xf32, #tpu.memory_space<vmem>>, vector<8x1xf32>
    %31 = vector.broadcast %30 : vector<8x1xf32> to vector<8x256xf32>
    %32 = arith.addf %29, %31 : vector<8x256xf32>
    %cst_28 = arith.constant 0.000000e+00 : f32
    %33 = vector.broadcast %cst_28 : f32 to vector<8x256xf32>
    %34 = arith.maximumf %32, %33 : vector<8x256xf32>
    %35 = arith.truncf %34 : vector<8x256xf32> to vector<8x256xbf16>
    %c2_29 = arith.constant 2 : index
    %c0_30 = arith.constant 0 : index
    %c0_31 = arith.constant 0 : index
    %36 = vector.load %arg9[%c2_29, %c0_30, %c0_31] : memref<8x8x256xbf16, #tpu.memory_space<vmem>>, vector<1x8x256xbf16>
    %37 = vector.shape_cast %36 : vector<1x8x256xbf16> to vector<8x256xbf16>
    %38 = vector.shape_cast %35 : vector<8x256xbf16> to vector<1x8x256xbf16>
    tpu.vector_store %arg9[%c2_29, %c0_30, %c0_31], %38 {strides = array<i32>} : memref<8x8x256xbf16, #tpu.memory_space<vmem>>, vector<1x8x256xbf16>,
    %c0_32 = arith.constant 0 : index
    %c0_33 = arith.constant 0 : index
    %39 = vector.load %arg2[%c0_32, %c0_33] : memref<8x36xbf16, #tpu.memory_space<vmem>>, vector<8x36xbf16>
    %c3 = arith.constant 3 : index
    %c0_34 = arith.constant 0 : index
    %c0_35 = arith.constant 0 : index
    %40 = vector.load %arg1[%c3, %c0_34, %c0_35] : memref<8x36x256xbf16, #tpu.memory_space<vmem>>, vector<1x36x256xbf16>
    %41 = vector.shape_cast %40 : vector<1x36x256xbf16> to vector<36x256xbf16>
    %cst_36 = arith.constant dense<0.000000e+00> : vector<8x256xf32>
    %42 = tpu.matmul %39, %41, %cst_36 {dimension_numbers = #tpu.dot_dimension_numbers<[1], [0], [0], [1], [0, 0, 1, 1], [], []>} : vector<8x36xbf16>, vector<36x256xbf16>, vector<8x256xf32> -> vector<8x256xf32>
    %c0_37 = arith.constant 0 : index
    %c0_38 = arith.constant 0 : index
    %43 = vector.load %arg3[%c0_37, %c0_38] : memref<8x1xf32, #tpu.memory_space<vmem>>, vector<8x1xf32>
    %44 = vector.broadcast %43 : vector<8x1xf32> to vector<8x256xf32>
    %45 = arith.addf %42, %44 : vector<8x256xf32>
    %cst_39 = arith.constant 0.000000e+00 : f32
    %46 = vector.broadcast %cst_39 : f32 to vector<8x256xf32>
    %47 = arith.maximumf %45, %46 : vector<8x256xf32>
    %48 = arith.truncf %47 : vector<8x256xf32> to vector<8x256xbf16>
    %c3_40 = arith.constant 3 : index
    %c0_41 = arith.constant 0 : index
    %c0_42 = arith.constant 0 : index
    %49 = vector.load %arg9[%c3_40, %c0_41, %c0_42] : memref<8x8x256xbf16, #tpu.memory_space<vmem>>, vector<1x8x256xbf16>
    %50 = vector.shape_cast %49 : vector<1x8x256xbf16> to vector<8x256xbf16>
    %51 = vector.shape_cast %48 : vector<8x256xbf16> to vector<1x8x256xbf16>
    tpu.vector_store %arg9[%c3_40, %c0_41, %c0_42], %51 {strides = array<i32>} : memref<8x8x256xbf16, #tpu.memory_space<vmem>>, vector<1x8x256xbf16>,
    %c0_43 = arith.constant 0 : index
    %c0_44 = arith.constant 0 : index
    %52 = vector.load %arg2[%c0_43, %c0_44] : memref<8x36xbf16, #tpu.memory_space<vmem>>, vector<8x36xbf16>
    %c4 = arith.constant 4 : index
    %c0_45 = arith.constant 0 : index
    %c0_46 = arith.constant 0 : index
    %53 = vector.load %arg1[%c4, %c0_45, %c0_46] : memref<8x36x256xbf16, #tpu.memory_space<vmem>>, vector<1x36x256xbf16>
    %54 = vector.shape_cast %53 : vector<1x36x256xbf16> to vector<36x256xbf16>
    %cst_47 = arith.constant dense<0.000000e+00> : vector<8x256xf32>
    %55 = tpu.matmul %52, %54, %cst_47 {dimension_numbers = #tpu.dot_dimension_numbers<[1], [0], [0], [1], [0, 0, 1, 1], [], []>} : vector<8x36xbf16>, vector<36x256xbf16>, vector<8x256xf32> -> vector<8x256xf32>
    %c0_48 = arith.constant 0 : index
    %c0_49 = arith.constant 0 : index
    %56 = vector.load %arg3[%c0_48, %c0_49] : memref<8x1xf32, #tpu.memory_space<vmem>>, vector<8x1xf32>
    %57 = vector.broadcast %56 : vector<8x1xf32> to vector<8x256xf32>
    %58 = arith.addf %55, %57 : vector<8x256xf32>
    %cst_50 = arith.constant 0.000000e+00 : f32
    %59 = vector.broadcast %cst_50 : f32 to vector<8x256xf32>
    %60 = arith.maximumf %58, %59 : vector<8x256xf32>
    %61 = arith.truncf %60 : vector<8x256xf32> to vector<8x256xbf16>
    %c4_51 = arith.constant 4 : index
    %c0_52 = arith.constant 0 : index
    %c0_53 = arith.constant 0 : index
    %62 = vector.load %arg9[%c4_51, %c0_52, %c0_53] : memref<8x8x256xbf16, #tpu.memory_space<vmem>>, vector<1x8x256xbf16>
    %63 = vector.shape_cast %62 : vector<1x8x256xbf16> to vector<8x256xbf16>
    %64 = vector.shape_cast %61 : vector<8x256xbf16> to vector<1x8x256xbf16>
    tpu.vector_store %arg9[%c4_51, %c0_52, %c0_53], %64 {strides = array<i32>} : memref<8x8x256xbf16, #tpu.memory_space<vmem>>, vector<1x8x256xbf16>,
    %c0_54 = arith.constant 0 : index
    %c0_55 = arith.constant 0 : index
    %65 = vector.load %arg2[%c0_54, %c0_55] : memref<8x36xbf16, #tpu.memory_space<vmem>>, vector<8x36xbf16>
    %c5 = arith.constant 5 : index
    %c0_56 = arith.constant 0 : index
    %c0_57 = arith.constant 0 : index
    %66 = vector.load %arg1[%c5, %c0_56, %c0_57] : memref<8x36x256xbf16, #tpu.memory_space<vmem>>, vector<1x36x256xbf16>
    %67 = vector.shape_cast %66 : vector<1x36x256xbf16> to vector<36x256xbf16>
    %cst_58 = arith.constant dense<0.000000e+00> : vector<8x256xf32>
    %68 = tpu.matmul %65, %67, %cst_58 {dimension_numbers = #tpu.dot_dimension_numbers<[1], [0], [0], [1], [0, 0, 1, 1], [], []>} : vector<8x36xbf16>, vector<36x256xbf16>, vector<8x256xf32> -> vector<8x256xf32>
    %c0_59 = arith.constant 0 : index
    %c0_60 = arith.constant 0 : index
    %69 = vector.load %arg3[%c0_59, %c0_60] : memref<8x1xf32, #tpu.memory_space<vmem>>, vector<8x1xf32>
    %70 = vector.broadcast %69 : vector<8x1xf32> to vector<8x256xf32>
    %71 = arith.addf %68, %70 : vector<8x256xf32>
    %cst_61 = arith.constant 0.000000e+00 : f32
    %72 = vector.broadcast %cst_61 : f32 to vector<8x256xf32>
    %73 = arith.maximumf %71, %72 : vector<8x256xf32>
    %74 = arith.truncf %73 : vector<8x256xf32> to vector<8x256xbf16>
    %c5_62 = arith.constant 5 : index
    %c0_63 = arith.constant 0 : index
    %c0_64 = arith.constant 0 : index
    %75 = vector.load %arg9[%c5_62, %c0_63, %c0_64] : memref<8x8x256xbf16, #tpu.memory_space<vmem>>, vector<1x8x256xbf16>
    %76 = vector.shape_cast %75 : vector<1x8x256xbf16> to vector<8x256xbf16>
    %77 = vector.shape_cast %74 : vector<8x256xbf16> to vector<1x8x256xbf16>
    tpu.vector_store %arg9[%c5_62, %c0_63, %c0_64], %77 {strides = array<i32>} : memref<8x8x256xbf16, #tpu.memory_space<vmem>>, vector<1x8x256xbf16>,
    %c0_65 = arith.constant 0 : index
    %c0_66 = arith.constant 0 : index
    %78 = vector.load %arg2[%c0_65, %c0_66] : memref<8x36xbf16, #tpu.memory_space<vmem>>, vector<8x36xbf16>
    %c6 = arith.constant 6 : index
    %c0_67 = arith.constant 0 : index
    %c0_68 = arith.constant 0 : index
    %79 = vector.load %arg1[%c6, %c0_67, %c0_68] : memref<8x36x256xbf16, #tpu.memory_space<vmem>>, vector<1x36x256xbf16>
    %80 = vector.shape_cast %79 : vector<1x36x256xbf16> to vector<36x256xbf16>
    %cst_69 = arith.constant dense<0.000000e+00> : vector<8x256xf32>
    %81 = tpu.matmul %78, %80, %cst_69 {dimension_numbers = #tpu.dot_dimension_numbers<[1], [0], [0], [1], [0, 0, 1, 1], [], []>} : vector<8x36xbf16>, vector<36x256xbf16>, vector<8x256xf32> -> vector<8x256xf32>
    %c0_70 = arith.constant 0 : index
    %c0_71 = arith.constant 0 : index
    %82 = vector.load %arg3[%c0_70, %c0_71] : memref<8x1xf32, #tpu.memory_space<vmem>>, vector<8x1xf32>
    %83 = vector.broadcast %82 : vector<8x1xf32> to vector<8x256xf32>
    %84 = arith.addf %81, %83 : vector<8x256xf32>
    %cst_72 = arith.constant 0.000000e+00 : f32
    %85 = vector.broadcast %cst_72 : f32 to vector<8x256xf32>
    %86 = arith.maximumf %84, %85 : vector<8x256xf32>
    %87 = arith.truncf %86 : vector<8x256xf32> to vector<8x256xbf16>
    %c6_73 = arith.constant 6 : index
    %c0_74 = arith.constant 0 : index
    %c0_75 = arith.constant 0 : index
    %88 = vector.load %arg9[%c6_73, %c0_74, %c0_75] : memref<8x8x256xbf16, #tpu.memory_space<vmem>>, vector<1x8x256xbf16>
    %89 = vector.shape_cast %88 : vector<1x8x256xbf16> to vector<8x256xbf16>
    %90 = vector.shape_cast %87 : vector<8x256xbf16> to vector<1x8x256xbf16>
    tpu.vector_store %arg9[%c6_73, %c0_74, %c0_75], %90 {strides = array<i32>} : memref<8x8x256xbf16, #tpu.memory_space<vmem>>, vector<1x8x256xbf16>,
    %c0_76 = arith.constant 0 : index
    %c0_77 = arith.constant 0 : index
    %91 = vector.load %arg2[%c0_76, %c0_77] : memref<8x36xbf16, #tpu.memory_space<vmem>>, vector<8x36xbf16>
    %c7 = arith.constant 7 : index
    %c0_78 = arith.constant 0 : index
    %c0_79 = arith.constant 0 : index
    %92 = vector.load %arg1[%c7, %c0_78, %c0_79] : memref<8x36x256xbf16, #tpu.memory_space<vmem>>, vector<1x36x256xbf16>
    %93 = vector.shape_cast %92 : vector<1x36x256xbf16> to vector<36x256xbf16>
    %cst_80 = arith.constant dense<0.000000e+00> : vector<8x256xf32>
    %94 = tpu.matmul %91, %93, %cst_80 {dimension_numbers = #tpu.dot_dimension_numbers<[1], [0], [0], [1], [0, 0, 1, 1], [], []>} : vector<8x36xbf16>, vector<36x256xbf16>, vector<8x256xf32> -> vector<8x256xf32>
    %c0_81 = arith.constant 0 : index
    %c0_82 = arith.constant 0 : index
    %95 = vector.load %arg3[%c0_81, %c0_82] : memref<8x1xf32, #tpu.memory_space<vmem>>, vector<8x1xf32>
    %96 = vector.broadcast %95 : vector<8x1xf32> to vector<8x256xf32>
    %97 = arith.addf %94, %96 : vector<8x256xf32>
    %cst_83 = arith.constant 0.000000e+00 : f32
    %98 = vector.broadcast %cst_83 : f32 to vector<8x256xf32>
    %99 = arith.maximumf %97, %98 : vector<8x256xf32>
    %100 = arith.truncf %99 : vector<8x256xf32> to vector<8x256xbf16>
    %c7_84 = arith.constant 7 : index
    %c0_85 = arith.constant 0 : index
    %c0_86 = arith.constant 0 : index
    %101 = vector.load %arg9[%c7_84, %c0_85, %c0_86] : memref<8x8x256xbf16, #tpu.memory_space<vmem>>, vector<1x8x256xbf16>
    %102 = vector.shape_cast %101 : vector<1x8x256xbf16> to vector<8x256xbf16>
    %103 = vector.shape_cast %100 : vector<8x256xbf16> to vector<1x8x256xbf16>
    tpu.vector_store %arg9[%c7_84, %c0_85, %c0_86], %103 {strides = array<i32>} : memref<8x8x256xbf16, #tpu.memory_space<vmem>>, vector<1x8x256xbf16>,
    %cst_87 = arith.constant 0.000000e+00 : f32
    %104 = vector.broadcast %cst_87 : f32 to vector<8x32xf32>
    %c0_88 = arith.constant 0 : index
    %c0_89 = arith.constant 0 : index
    %c0_90 = arith.constant 0 : index
    %105 = vector.load %arg9[%c0_88, %c0_89, %c0_90] : memref<8x8x256xbf16, #tpu.memory_space<vmem>>, vector<8x1x256xbf16>
    %106 = vector.shape_cast %105 : vector<8x1x256xbf16> to vector<8x256xbf16>
    %c0_91 = arith.constant 0 : index
    %c0_92 = arith.constant 0 : index
    %c0_93 = arith.constant 0 : index
    %107 = vector.load %arg4[%c0_91, %c0_92, %c0_93] : memref<8x256x32xbf16, #tpu.memory_space<vmem>>, vector<1x256x32xbf16>
    %108 = vector.shape_cast %107 : vector<1x256x32xbf16> to vector<256x32xbf16>
    %cst_94 = arith.constant dense<0.000000e+00> : vector<8x32xf32>
    %109 = tpu.matmul %106, %108, %cst_94 {dimension_numbers = #tpu.dot_dimension_numbers<[1], [0], [0], [1], [0, 0, 1, 1], [], []>} : vector<8x256xbf16>, vector<256x32xbf16>, vector<8x32xf32> -> vector<8x32xf32>
    %110 = arith.addf %104, %109 : vector<8x32xf32>
    %c0_95 = arith.constant 0 : index
    %c1_96 = arith.constant 1 : index
    %c0_97 = arith.constant 0 : index
    %111 = vector.load %arg9[%c0_95, %c1_96, %c0_97] : memref<8x8x256xbf16, #tpu.memory_space<vmem>>, vector<8x1x256xbf16>
    %112 = vector.shape_cast %111 : vector<8x1x256xbf16> to vector<8x256xbf16>
    %c1_98 = arith.constant 1 : index
    %c0_99 = arith.constant 0 : index
    %c0_100 = arith.constant 0 : index
    %113 = vector.load %arg4[%c1_98, %c0_99, %c0_100] : memref<8x256x32xbf16, #tpu.memory_space<vmem>>, vector<1x256x32xbf16>
    %114 = vector.shape_cast %113 : vector<1x256x32xbf16> to vector<256x32xbf16>
    %cst_101 = arith.constant dense<0.000000e+00> : vector<8x32xf32>
    %115 = tpu.matmul %112, %114, %cst_101 {dimension_numbers = #tpu.dot_dimension_numbers<[1], [0], [0], [1], [0, 0, 1, 1], [], []>} : vector<8x256xbf16>, vector<256x32xbf16>, vector<8x32xf32> -> vector<8x32xf32>
    %116 = arith.addf %110, %115 : vector<8x32xf32>
    %c0_102 = arith.constant 0 : index
    %c2_103 = arith.constant 2 : index
    %c0_104 = arith.constant 0 : index
    %117 = vector.load %arg9[%c0_102, %c2_103, %c0_104] : memref<8x8x256xbf16, #tpu.memory_space<vmem>>, vector<8x1x256xbf16>
    %118 = vector.shape_cast %117 : vector<8x1x256xbf16> to vector<8x256xbf16>
    %c2_105 = arith.constant 2 : index
    %c0_106 = arith.constant 0 : index
    %c0_107 = arith.constant 0 : index
    %119 = vector.load %arg4[%c2_105, %c0_106, %c0_107] : memref<8x256x32xbf16, #tpu.memory_space<vmem>>, vector<1x256x32xbf16>
    %120 = vector.shape_cast %119 : vector<1x256x32xbf16> to vector<256x32xbf16>
    %cst_108 = arith.constant dense<0.000000e+00> : vector<8x32xf32>
    %121 = tpu.matmul %118, %120, %cst_108 {dimension_numbers = #tpu.dot_dimension_numbers<[1], [0], [0], [1], [0, 0, 1, 1], [], []>} : vector<8x256xbf16>, vector<256x32xbf16>, vector<8x32xf32> -> vector<8x32xf32>
    %122 = arith.addf %116, %121 : vector<8x32xf32>
    %c0_109 = arith.constant 0 : index
    %c3_110 = arith.constant 3 : index
    %c0_111 = arith.constant 0 : index
    %123 = vector.load %arg9[%c0_109, %c3_110, %c0_111] : memref<8x8x256xbf16, #tpu.memory_space<vmem>>, vector<8x1x256xbf16>
    %124 = vector.shape_cast %123 : vector<8x1x256xbf16> to vector<8x256xbf16>
    %c3_112 = arith.constant 3 : index
    %c0_113 = arith.constant 0 : index
    %c0_114 = arith.constant 0 : index
    %125 = vector.load %arg4[%c3_112, %c0_113, %c0_114] : memref<8x256x32xbf16, #tpu.memory_space<vmem>>, vector<1x256x32xbf16>
    %126 = vector.shape_cast %125 : vector<1x256x32xbf16> to vector<256x32xbf16>
    %cst_115 = arith.constant dense<0.000000e+00> : vector<8x32xf32>
    %127 = tpu.matmul %124, %126, %cst_115 {dimension_numbers = #tpu.dot_dimension_numbers<[1], [0], [0], [1], [0, 0, 1, 1], [], []>} : vector<8x256xbf16>, vector<256x32xbf16>, vector<8x32xf32> -> vector<8x32xf32>
    %128 = arith.addf %122, %127 : vector<8x32xf32>
    %c0_116 = arith.constant 0 : index
    %c4_117 = arith.constant 4 : index
    %c0_118 = arith.constant 0 : index
    %129 = vector.load %arg9[%c0_116, %c4_117, %c0_118] : memref<8x8x256xbf16, #tpu.memory_space<vmem>>, vector<8x1x256xbf16>
    %130 = vector.shape_cast %129 : vector<8x1x256xbf16> to vector<8x256xbf16>
    %c4_119 = arith.constant 4 : index
    %c0_120 = arith.constant 0 : index
    %c0_121 = arith.constant 0 : index
    %131 = vector.load %arg4[%c4_119, %c0_120, %c0_121] : memref<8x256x32xbf16, #tpu.memory_space<vmem>>, vector<1x256x32xbf16>
    %132 = vector.shape_cast %131 : vector<1x256x32xbf16> to vector<256x32xbf16>
    %cst_122 = arith.constant dense<0.000000e+00> : vector<8x32xf32>
    %133 = tpu.matmul %130, %132, %cst_122 {dimension_numbers = #tpu.dot_dimension_numbers<[1], [0], [0], [1], [0, 0, 1, 1], [], []>} : vector<8x256xbf16>, vector<256x32xbf16>, vector<8x32xf32> -> vector<8x32xf32>
    %134 = arith.addf %128, %133 : vector<8x32xf32>
    %c0_123 = arith.constant 0 : index
    %c5_124 = arith.constant 5 : index
    %c0_125 = arith.constant 0 : index
    %135 = vector.load %arg9[%c0_123, %c5_124, %c0_125] : memref<8x8x256xbf16, #tpu.memory_space<vmem>>, vector<8x1x256xbf16>
    %136 = vector.shape_cast %135 : vector<8x1x256xbf16> to vector<8x256xbf16>
    %c5_126 = arith.constant 5 : index
    %c0_127 = arith.constant 0 : index
    %c0_128 = arith.constant 0 : index
    %137 = vector.load %arg4[%c5_126, %c0_127, %c0_128] : memref<8x256x32xbf16, #tpu.memory_space<vmem>>, vector<1x256x32xbf16>
    %138 = vector.shape_cast %137 : vector<1x256x32xbf16> to vector<256x32xbf16>
    %cst_129 = arith.constant dense<0.000000e+00> : vector<8x32xf32>
    %139 = tpu.matmul %136, %138, %cst_129 {dimension_numbers = #tpu.dot_dimension_numbers<[1], [0], [0], [1], [0, 0, 1, 1], [], []>} : vector<8x256xbf16>, vector<256x32xbf16>, vector<8x32xf32> -> vector<8x32xf32>
    %140 = arith.addf %134, %139 : vector<8x32xf32>
    %c0_130 = arith.constant 0 : index
    %c6_131 = arith.constant 6 : index
    %c0_132 = arith.constant 0 : index
    %141 = vector.load %arg9[%c0_130, %c6_131, %c0_132] : memref<8x8x256xbf16, #tpu.memory_space<vmem>>, vector<8x1x256xbf16>
    %142 = vector.shape_cast %141 : vector<8x1x256xbf16> to vector<8x256xbf16>
    %c6_133 = arith.constant 6 : index
    %c0_134 = arith.constant 0 : index
    %c0_135 = arith.constant 0 : index
    %143 = vector.load %arg4[%c6_133, %c0_134, %c0_135] : memref<8x256x32xbf16, #tpu.memory_space<vmem>>, vector<1x256x32xbf16>
    %144 = vector.shape_cast %143 : vector<1x256x32xbf16> to vector<256x32xbf16>
    %cst_136 = arith.constant dense<0.000000e+00> : vector<8x32xf32>
    %145 = tpu.matmul %142, %144, %cst_136 {dimension_numbers = #tpu.dot_dimension_numbers<[1], [0], [0], [1], [0, 0, 1, 1], [], []>} : vector<8x256xbf16>, vector<256x32xbf16>, vector<8x32xf32> -> vector<8x32xf32>
    %146 = arith.addf %140, %145 : vector<8x32xf32>
    %c0_137 = arith.constant 0 : index
    %c7_138 = arith.constant 7 : index
    %c0_139 = arith.constant 0 : index
    %147 = vector.load %arg9[%c0_137, %c7_138, %c0_139] : memref<8x8x256xbf16, #tpu.memory_space<vmem>>, vector<8x1x256xbf16>
    %148 = vector.shape_cast %147 : vector<8x1x256xbf16> to vector<8x256xbf16>
    %c7_140 = arith.constant 7 : index
    %c0_141 = arith.constant 0 : index
    %c0_142 = arith.constant 0 : index
    %149 = vector.load %arg4[%c7_140, %c0_141, %c0_142] : memref<8x256x32xbf16, #tpu.memory_space<vmem>>, vector<1x256x32xbf16>
    %150 = vector.shape_cast %149 : vector<1x256x32xbf16> to vector<256x32xbf16>
    %cst_143 = arith.constant dense<0.000000e+00> : vector<8x32xf32>
    %151 = tpu.matmul %148, %150, %cst_143 {dimension_numbers = #tpu.dot_dimension_numbers<[1], [0], [0], [1], [0, 0, 1, 1], [], []>} : vector<8x256xbf16>, vector<256x32xbf16>, vector<8x32xf32> -> vector<8x32xf32>
    %152 = arith.addf %146, %151 : vector<8x32xf32>
    %c0_144 = arith.constant 0 : index
    %c0_145 = arith.constant 0 : index
    %153 = vector.load %arg5[%c0_144, %c0_145] : memref<1x32xf32, #tpu.memory_space<vmem>>, vector<1x32xf32>
    %154 = vector.broadcast %153 : vector<1x32xf32> to vector<8x32xf32>
    %155 = arith.addf %152, %154 : vector<8x32xf32>
    %156 = arith.truncf %155 : vector<8x32xf32> to vector<8x32xbf16>
    %c0_146 = arith.constant 0 : index
    %c0_147 = arith.constant 0 : index
    %157 = vector.load %arg6[%c0_146, %c0_147] : memref<32x1024xbf16, #tpu.memory_space<vmem>>, vector<32x1024xbf16>
    %cst_148 = arith.constant dense<0.000000e+00> : vector<8x1024xf32>
    %158 = tpu.matmul %156, %157, %cst_148 {dimension_numbers = #tpu.dot_dimension_numbers<[1], [0], [0], [1], [0, 0, 1, 1], [], []>} : vector<8x32xbf16>, vector<32x1024xbf16>, vector<8x1024xf32> -> vector<8x1024xf32>
    %c0_149 = arith.constant 0 : index
    %c0_150 = arith.constant 0 : index
    %159 = vector.load %arg7[%c0_149, %c0_150] : memref<1x1024xf32, #tpu.memory_space<vmem>>, vector<1x1024xf32>
    %160 = vector.broadcast %159 : vector<1x1024xf32> to vector<8x1024xf32>
    %161 = arith.addf %158, %160 : vector<8x1024xf32>
    %cst_151 = arith.constant 1.000000e+00 : f32
    %162 = vector.broadcast %cst_151 : f32 to vector<8x1024xf32>
    %163 = arith.mulf %162, %161 : vector<8x1024xf32>
    %164 = arith.negf %163 : vector<8x1024xf32>
    %165 = math.exp %164 : vector<8x1024xf32>
    %cst_152 = arith.constant 1.000000e+00 : f32
    %166 = vector.broadcast %cst_152 : f32 to vector<8x1024xf32>
    %167 = arith.addf %166, %165 : vector<8x1024xf32>
    %168 = arith.divf %166, %167 : vector<8x1024xf32>
    %c0_153 = arith.constant 0 : index
    %c0_154 = arith.constant 0 : index
    %169 = vector.load %arg8[%c0_153, %c0_154] : memref<8x1024xf32, #tpu.memory_space<vmem>>, vector<8x1024xf32>
    tpu.vector_store %arg8[%c0_153, %c0_154], %168 {strides = array<i32>} : memref<8x1024xf32, #tpu.memory_space<vmem>>, vector<8x1024xf32>,
    return
  }
  func.func @transform_0(%arg0: i32) -> (i32, i32, i32) {
    %c0_i32 = arith.constant 0 : i32
    %c0_i32_0 = arith.constant 0 : i32
    %c0_i32_1 = arith.constant 0 : i32
    return %arg0, %c0_i32, %c0_i32_0 : i32, i32, i32
  }
  func.func @transform_1(%arg0: i32) -> (i32, i32) {
    %c0_i32 = arith.constant 0 : i32
    %c0_i32_0 = arith.constant 0 : i32
    %c0_i32_1 = arith.constant 0 : i32
    return %c0_i32, %c0_i32_0 : i32, i32
  }
  func.func @transform_2(%arg0: i32) -> (i32, i32) {
    %c0_i32 = arith.constant 0 : i32
    %c0_i32_0 = arith.constant 0 : i32
    %c0_i32_1 = arith.constant 0 : i32
    return %c0_i32, %c0_i32_0 : i32, i32
  }
  func.func @transform_3(%arg0: i32) -> (i32, i32, i32) {
    %c0_i32 = arith.constant 0 : i32
    %c0_i32_0 = arith.constant 0 : i32
    %c0_i32_1 = arith.constant 0 : i32
    %c0_i32_2 = arith.constant 0 : i32
    return %c0_i32, %c0_i32_0, %c0_i32_1 : i32, i32, i32
  }
  func.func @transform_4(%arg0: i32) -> (i32, i32) {
    %c0_i32 = arith.constant 0 : i32
    %c0_i32_0 = arith.constant 0 : i32
    %c0_i32_1 = arith.constant 0 : i32
    return %c0_i32, %c0_i32_0 : i32, i32
  }
  func.func @transform_5(%arg0: i32) -> (i32, i32) {
    %c0_i32 = arith.constant 0 : i32
    %c0_i32_0 = arith.constant 0 : i32
    %c0_i32_1 = arith.constant 0 : i32
    return %c0_i32, %c0_i32_0 : i32, i32
  }
  func.func @transform_6(%arg0: i32) -> (i32, i32) {
    %c0_i32 = arith.constant 0 : i32
    %c0_i32_0 = arith.constant 0 : i32
    %c0_i32_1 = arith.constant 0 : i32
    return %c0_i32, %c0_i32_0 : i32, i32
  }
  func.func @transform_7(%arg0: i32) -> (i32, i32) {
    %c0_i32 = arith.constant 0 : i32
    %c0_i32_0 = arith.constant 0 : i32
    return %arg0, %c0_i32 : i32, i32
  }
}

</mosaic_0001>

<bundles_post_ra>
// kernel: tpu_custom_call.1
= control target key start
LH: loop header
LB: loop body
LE: loop exit
PB: predicated region body
PF: predicated region fallthrough
CT: control target
= control target key end

     0   :  { %vm69_vm0 = vcmask 1041408   ;;  %vm65_vm1 = vcmask 293888   ;;  %s5464_s0 = inlined_call_operand.vmem [shape: bf16[8,36,256], index: 0, kind: input, shape index: {}]   ;;  %s5465_s1 = inlined_call_operand.vmem [shape: bf16[8,36], index: 1, kind: input, shape index: {}]   ;;  %s5466_s2 = inlined_call_operand.vmem [shape: f32[8,1], index: 2, kind: input, shape index: {}]   ;;  %s5467_s3 = inlined_call_operand.vmem [shape: bf16[8,256,32], index: 3, kind: input, shape index: {}]   ;;  %s5468_s4 = inlined_call_operand.vmem [shape: f32[1,32], index: 4, kind: input, shape index: {}]   ;;  %s5469_s5 = inlined_call_operand.vmem [shape: bf16[32,1024], index: 5, kind: input, shape index: {}]   ;;  %s5470_s6 = inlined_call_operand.vmem [shape: f32[1,1024], index: 6, kind: input, shape index: {}]   ;;  %s5471_s7 = inlined_call_operand.hbm [shape: f32[8,1024], index: 7, kind: output, shape index: {}]  }
   0x1   :  { %v33_v0 = vld [vmem:[%s5464_s0 + $0x20] sm:$0x33]  ;;  %v2842_v1 = vld [vmem:[%s5464_s0 + $0x48] sm:$0x33]  ;;  %v2830_v6 = vld [vmem:[%s5464_s0 + $0x10] sm:$0xf] }
   0x2   :  { %v53_v2 = vunpack.c.l.b16 %v33_v0  ;;  %v54_v3 = vunpack.c.h.b16 %v33_v0  ;;  %v132_v4 = vunpack.c.l.b16 %v2842_v1  ;;  %v133_v5 = vunpack.c.h.b16 %v2842_v1  ;;  %v3882_v7 = vld [vmem:[%s5464_s0 + $0x14] sm:$0xf0]  ;;  %v3881_v12 = vld [vmem:[%s5464_s0 + $0x14] sm:$0xf]  ;;  %v2832_v13 = vld [vmem:[%s5464_s0 + $0x18] sm:$0xf0] }
   0x3   :  { %v2853_v14 = vld [vmem:[%s5464_s0 + $0x38] sm:$0xf]  ;;  %v3886_v15 = vld [vmem:[%s5464_s0 + $0x3c] sm:$0xf0]  ;;  %v3885_v16 = vld [vmem:[%s5464_s0 + $0x3c] sm:$0xf]  ;;  %v2831_v23 = vor.u32 %v3882_v7, %v2830_v6  ;;  %v2835_v24 = vor.u32 %v3881_v12, %v2832_v13 }
   0x4   :  { %v59_v8 = vpack.c.b16 %v53_v2, %v53_v2  ;;  %v60_v9 = vpack.c.b16 %v54_v3, %v54_v3  ;;  %v138_v10 = vpack.c.b16 %v132_v4, %v132_v4  ;;  %v139_v11 = vpack.c.b16 %v133_v5, %v133_v5  ;;  %v2855_v17 = vld [vmem:[%s5464_s0 + $0x40] sm:$0xf0]  ;;  %v2822_v22 = vld [vmem:[%s5464_s0] sm:$0xf]  ;;  %v3880_v25 = vld [vmem:[%s5464_s0 + $0x4] sm:$0xf0] }
   0x5   :  { %v3879_v26 = vld [vmem:[%s5464_s0 + $0x4] sm:$0xf]  ;;  %v2824_v27 = vld [vmem:[%s5464_s0 + $0x8] sm:$0xf0]  ;;  %v2854_v28 = vor.u32 %v3886_v15, %v2853_v14  ;;  %v2858_v29 = vor.u32 %v3885_v16, %v2855_v17  ;;  %v2845_v30 = vld [vmem:[%s5464_s0 + $0x28] sm:$0xf]  ;;  %v2823_v38 = vor.u32 %v3880_v25, %v2822_v22 }
   0x6   :  { %v71_v18 = vsel %vm69_vm0, %v59_v8, 0  ;;  %v74_v19 = vsel %vm69_vm0, %v60_v9, 0  ;;  %v148_v20 = vsel %vm69_vm0, %v138_v10, 0  ;;  %v151_v21 = vsel %vm69_vm0, %v139_v11, 0  ;;  %v3884_v31 = vld [vmem:[%s5464_s0 + $0x2c] sm:$0xf0] }
   0x7   :  { %81 = vmatpush.bf16.msra.mxu0 %v71_v18  ;;  %94 = vmatpush.bf16.msra.mxu1 %v74_v19  ;;  %v2865_v32 = vld [vmem:[%s5464_s0 + $0x70] sm:$0x33]  ;;  %v3883_v33 = vld [vmem:[%s5464_s0 + $0x2c] sm:$0xf]  ;;  %v2888_v37 = vld [vmem:[%s5464_s0 + $0x98] sm:$0x33]  ;;  %v2827_v41 = vor.u32 %v3879_v26, %v2824_v27  ;;  %v2846_v44 = vor.u32 %v3884_v31, %v2845_v30 }
   0x8   :  { %158 = vmatpush.bf16.msra.mxu2 %v148_v20  ;;  %171 = vmatpush.bf16.msra.mxu3 %v151_v21  ;;  %v2847_v34 = vld [vmem:[%s5464_s0 + $0x30] sm:$0xf0]  ;;  %v210_v35 = vunpack.c.l.b16 %v2865_v32  ;;  %v211_v36 = vunpack.c.h.b16 %v2865_v32  ;;  %v288_v39 = vunpack.c.l.b16 %v2888_v37  ;;  %v289_v40 = vunpack.c.h.b16 %v2888_v37  ;;  %v2876_v46 = vld [vmem:[%s5464_s0 + $0x60] sm:$0xf]  ;;  %v3890_v49 = vld [vmem:[%s5464_s0 + $0x64] sm:$0xf0] }
   0x9   :  { %v2850_v45 = vor.u32 %v3883_v33, %v2847_v34  ;;  %v3889_v50 = vld [vmem:[%s5464_s0 + $0x64] sm:$0xf]  ;;  %v2878_v51 = vld [vmem:[%s5464_s0 + $0x68] sm:$0xf0]  ;;  %v28_v52 = vld [vmem:[%s5465_s1] sm:$0xf]  ;;  %v2877_v58 = vor.u32 %v3890_v49, %v2876_v46 }
   0xa   :  { %v216_v42 = vpack.c.b16 %v210_v35, %v210_v35  ;;  %v217_v43 = vpack.c.b16 %v211_v36, %v211_v36  ;;  %v294_v47 = vpack.c.b16 %v288_v39, %v288_v39  ;;  %v295_v48 = vpack.c.b16 %v289_v40, %v289_v40  ;;  %v106_v55 = vld [vmem:[%s5465_s1] sm:$0xf]  ;;  %v2899_v56 = vld [vmem:[%s5464_s0 + $0x88] sm:$0xf]  ;;  %v3894_v57 = vld [vmem:[%s5464_s0 + $0x8c] sm:$0xf0] }
   0xb   :  { %82 = vmatpush.bf16.msra.mxu0 %v2831_v23  ;;  %95 = vmatpush.bf16.msra.mxu1 %v2835_v24  ;;  %v2881_v59 = vor.u32 %v3889_v50, %v2878_v51  ;;  %v3893_v60 = vld [vmem:[%s5464_s0 + $0x8c] sm:$0xf]  ;;  %v2911_v61 = vld [vmem:[%s5464_s0 + $0xc0] sm:$0x33]  ;;  %v2901_v1 = vld [vmem:[%s5464_s0 + $0x90] sm:$0xf0]  ;;  %v2900_v12 = vor.u32 %v3894_v57, %v2899_v56 }
   0xc   :  { %159 = vmatpush.bf16.msra.mxu2 %v2854_v28  ;;  %172 = vmatpush.bf16.msra.mxu3 %v2858_v29  ;;  %v226_v53 = vsel %vm69_vm0, %v216_v42, 0  ;;  %v229_v54 = vsel %vm69_vm0, %v217_v43, 0  ;;  %v2934_v62 = vld [vmem:[%s5464_s0 + $0xe8] sm:$0x33]  ;;  %v304_v63 = vsel %vm69_vm0, %v294_v47, 0  ;;  %v307_v0 = vsel %vm69_vm0, %v295_v48, 0 }
   0xd   :  { %v2868_v2 = vld [vmem:[%s5464_s0 + $0x50] sm:$0xf]  ;;  %v366_v3 = vunpack.c.l.b16 %v2911_v61  ;;  %v367_v4 = vunpack.c.h.b16 %v2911_v61  ;;  %v3888_v5 = vld [vmem:[%s5464_s0 + $0x54] sm:$0xf0]  ;;  %v3887_v6 = vld [vmem:[%s5464_s0 + $0x54] sm:$0xf]  ;;  %v444_v8 = vunpack.c.l.b16 %v2934_v62  ;;  %v445_v9 = vunpack.c.h.b16 %v2934_v62 }
   0xe   :  { %v2870_v7 = vld [vmem:[%s5464_s0 + $0x58] sm:$0xf0]  ;;  %v2904_v13 = vor.u32 %v3893_v60, %v2901_v1  ;;  %v2891_v14 = vld [vmem:[%s5464_s0 + $0x78] sm:$0xf]  ;;  %v4287_v15 = vld [vmem:[%s5466_s2] sm:$0xff]  ;;  %v2869_v16 = vor.u32 %v3888_v5, %v2868_v2  ;;  %v4119_v21 = vmov 0  }
   0xf   :  { %83 = vmatpush.bf16.msra.mxu0 %v2823_v38  ;;  %96 = vmatpush.bf16.msra.mxu1 %v2827_v41  ;;  %v372_v10 = vpack.c.b16 %v366_v3, %v366_v3  ;;  %v373_v11 = vpack.c.b16 %v367_v4, %v367_v4  ;;  %v2873_v17 = vor.u32 %v3887_v6, %v2870_v7  ;;  %v3892_v18 = vld [vmem:[%s5464_s0 + $0x7c] sm:$0xf0]  ;;  %v3891_v19 = vld [vmem:[%s5464_s0 + $0x7c] sm:$0xf]  ;;  %v2893_v20 = vld [vmem:[%s5464_s0 + $0x80] sm:$0xf0] }
  0x10   :  { %160 = vmatpush.bf16.msra.mxu2 %v2846_v44  ;;  %173 = vmatpush.bf16.msra.mxu3 %v2850_v45  ;;  %v450_v22 = vpack.c.b16 %v444_v8, %v444_v8  ;;  %v451_v23 = vpack.c.b16 %v445_v9, %v445_v9  ;;  %v2922_v24 = vld [vmem:[%s5464_s0 + $0xb0] sm:$0xf]  ;;  %v3898_v25 = vld [vmem:[%s5464_s0 + $0xb4] sm:$0xf0]  ;;  %v3897_v28 = vld [vmem:[%s5464_s0 + $0xb4] sm:$0xf]  ;;  %v2892_v30 = vor.u32 %v3892_v18, %v2891_v14 }
  0x11   :  { %4058 = vset.pattern.permute.xlu1 %v4119_v21  ;;  %4057 = vset.pattern.permute.xlu0 %v4119_v21  ;;  %v382_v26 = vsel %vm69_vm0, %v372_v10, 0  ;;  %v385_v27 = vsel %vm69_vm0, %v373_v11, 0  ;;  %v2924_v29 = vld [vmem:[%s5464_s0 + $0xb8] sm:$0xf0]  ;;  %v2896_v31 = vor.u32 %v3891_v19, %v2893_v20  ;;  %v2957_v32 = vld [vmem:[%s5464_s0 + $0x110] sm:$0x33]  ;;  %v2923_v38 = vor.u32 %v3898_v25, %v2922_v24 }
  0x12   :  { %2836 = vmatmul.msk.bf16.vlgmr.msra.gmra.mxu0 %vm65_vm1, %v28_v52  ;;  %2837 = vmatmul.msk.bf16.vlgmr.msra.gmra.mxu1 %vm65_vm1, %v28_v52  ;;  %v2945_v33 = vld [vmem:[%s5464_s0 + $0xd8] sm:$0xf]  ;;  %v3902_v34 = vld [vmem:[%s5464_s0 + $0xdc] sm:$0xf0]  ;;  %v460_v36 = vsel %vm69_vm0, %v450_v22, 0  ;;  %v463_v37 = vsel %vm69_vm0, %v451_v23, 0  ;;  %v2927_v39 = vor.u32 %v3897_v28, %v2924_v29  ;;  %v522_v42 = vunpack.c.l.b16 %v2957_v32 }
  0x13   :  { %236 = vmatpush.bf16.msrb.mxu0 %v226_v53  ;;  %249 = vmatpush.bf16.msrb.mxu1 %v229_v54  ;;  %v2980_v35 = vld [vmem:[%s5464_s0 + $0x138] sm:$0x33]  ;;  %v2947_v41 = vld [vmem:[%s5464_s0 + $0xe0] sm:$0xf0]  ;;  %v523_v43 = vunpack.c.h.b16 %v2957_v32  ;;  %v2914_v44 = vld [vmem:[%s5464_s0 + $0xa0] sm:$0xf]  ;;  %v2946_v48 = vor.u32 %v3902_v34, %v2945_v33 }
  0x14   :  { %2859 = vmatmul.msk.bf16.vlgmr.msra.gmra.mxu2 %vm65_vm1, %v106_v55  ;;  %2860 = vmatmul.msk.bf16.vlgmr.msra.gmra.mxu3 %vm65_vm1, %v106_v55  ;;  %v3901_v40 = vld [vmem:[%s5464_s0 + $0xdc] sm:$0xf]  ;;  %v3896_v45 = vld [vmem:[%s5464_s0 + $0xa4] sm:$0xf0]  ;;  %v600_v46 = vunpack.c.l.b16 %v2980_v35  ;;  %v601_v47 = vunpack.c.h.b16 %v2980_v35  ;;  %v3895_v50 = vld [vmem:[%s5464_s0 + $0xa4] sm:$0xf]  ;;  %v528_v57 = vpack.c.b16 %v522_v42, %v522_v42 }
  0x15   :  { %314 = vmatpush.bf16.msrb.mxu2 %v304_v63  ;;  %327 = vmatpush.bf16.msrb.mxu3 %v307_v0  ;;  %v2950_v49 = vor.u32 %v3901_v40, %v2947_v41  ;;  %v2916_v51 = vld [vmem:[%s5464_s0 + $0xa8] sm:$0xf0]  ;;  %v2937_v52 = vld [vmem:[%s5464_s0 + $0xc8] sm:$0xf]  ;;  %v3900_v53 = vld [vmem:[%s5464_s0 + $0xcc] sm:$0xf0] }
  0x16   :  { %37 = vperm.xlu1 %4058, %v4287_v15   ;;  %116 = vperm.xlu0 %4057, %v4287_v15   ;;  %v3899_v54 = vld [vmem:[%s5464_s0 + $0xcc] sm:$0xf]  ;;  %v2939_v55 = vld [vmem:[%s5464_s0 + $0xd0] sm:$0xf0]  ;;  %v184_v56 = vld [vmem:[%s5465_s1] sm:$0xf] }
  0x17   :  { %237 = vmatpush.bf16.msrb.mxu0 %v2877_v58  ;;  %250 = vmatpush.bf16.msrb.mxu1 %v2881_v59  ;;  %v529_v58 = vpack.c.b16 %v523_v43, %v523_v43 }
  0x18   :  { %4059 = vset.pattern.permute.xlu2 %v4119_v21 }
  0x19   :  { %315 = vmatpush.bf16.msrb.mxu2 %v2900_v12  ;;  %328 = vmatpush.bf16.msrb.mxu3 %v2904_v13 }
  0x1b   :  { %238 = vmatpush.bf16.msrb.mxu0 %v2869_v16  ;;  %251 = vmatpush.bf16.msrb.mxu1 %v2873_v17 }
  0x1d   :  { %316 = vmatpush.bf16.msrb.mxu2 %v2892_v30  ;;  %329 = vmatpush.bf16.msrb.mxu3 %v2896_v31 }
  0x1e   :  { %194 = vperm.xlu0 %4057, %v4287_v15   ;;  %272 = vperm.xlu1 %4058, %v4287_v15  }
  0x1f   :  { %392 = vmatpush.bf16.msra.mxu0 %v382_v26  ;;  %405 = vmatpush.bf16.msra.mxu1 %v385_v27 }
  0x21   :  { %470 = vmatpush.bf16.msra.mxu2 %v460_v36  ;;  %483 = vmatpush.bf16.msra.mxu3 %v463_v37 }
  0x23   :  { %393 = vmatpush.bf16.msra.mxu0 %v2923_v38  ;;  %406 = vmatpush.bf16.msra.mxu1 %v2927_v39 }
  0x24   :  { %12 = vsyncpa [#allocation4], 0  ;;  %v262_v59 = vld [vmem:[%s5465_s1] sm:$0xf]  ;;  %v2915_v60 = vor.u32 %v3896_v45, %v2914_v44  ;;  %v2919_v61 = vor.u32 %v3895_v50, %v2916_v51  ;;  %v606_v62 = vpack.c.b16 %v600_v46, %v600_v46  ;;  %v607_v63 = vpack.c.b16 %v601_v47, %v601_v47  ;;  %350 = vperm.xlu2 %4059, %v4287_v15   ;;  %v3906_v3 = vld [vmem:[%s5464_s0 + $0x104] sm:$0xf0] }
  0x25   :  { %471 = vmatpush.bf16.msra.mxu2 %v2946_v48  ;;  %484 = vmatpush.bf16.msra.mxu3 %v2950_v49  ;;  %v2938_v0 = vor.u32 %v3900_v53, %v2937_v52  ;;  %v2942_v1 = vor.u32 %v3899_v54, %v2939_v55  ;;  %v2968_v2 = vld [vmem:[%s5464_s0 + $0x100] sm:$0xf]  ;;  %v3905_v4 = vld [vmem:[%s5464_s0 + $0x104] sm:$0xf]  ;;  %v2970_v5 = vld [vmem:[%s5464_s0 + $0x108] sm:$0xf0] }
  0x26   :  { %2882 = vmatmul.msk.bf16.vlgmr.msrb.gmra.mxu0 %vm65_vm1, %v184_v56  ;;  %2883 = vmatmul.msk.bf16.vlgmr.msrb.gmra.mxu1 %vm65_vm1, %v184_v56  ;;  %v538_v6 = vsel %vm69_vm0, %v528_v57, 0  ;;  %v541_v7 = vsel %vm69_vm0, %v529_v58, 0  ;;  %v2991_v8 = vld [vmem:[%s5464_s0 + $0x128] sm:$0xf]  ;;  %v3910_v9 = vld [vmem:[%s5464_s0 + $0x12c] sm:$0xf0]  ;;  %v2969_v14 = vor.u32 %v3906_v3, %v2968_v2  ;;  %v2973_v16 = vor.u32 %v3905_v4, %v2970_v5 }
  0x27   :  { %2905 = vmatmul.msk.bf16.vlgmr.msrb.gmra.mxu2 %vm65_vm1, %v262_v59  ;;  %2906 = vmatmul.msk.bf16.vlgmr.msrb.gmra.mxu3 %vm65_vm1, %v262_v59  ;;  %v616_v10 = vsel %vm69_vm0, %v606_v62, 0  ;;  %v619_v11 = vsel %vm69_vm0, %v607_v63, 0  ;;  %v3909_v12 = vld [vmem:[%s5464_s0 + $0x12c] sm:$0xf]  ;;  %v2993_v13 = vld [vmem:[%s5464_s0 + $0x130] sm:$0xf0]  ;;  %v2992_v19 = vor.u32 %v3910_v9, %v2991_v8 }
  0x28   :  { %394 = vmatpush.bf16.msra.mxu0 %v2915_v60  ;;  %407 = vmatpush.bf16.msra.mxu1 %v2919_v61  ;;  %v2960_v17 = vld [vmem:[%s5464_s0 + $0xf0] sm:$0xf]  ;;  %v3904_v18 = vld [vmem:[%s5464_s0 + $0xf4] sm:$0xf0]  ;;  %v2996_v20 = vor.u32 %v3909_v12, %v2993_v13  ;;  %v3903_v21 = vld [vmem:[%s5464_s0 + $0xf4] sm:$0xf] }
  0x29   :  { %472 = vmatpush.bf16.msra.mxu2 %v2938_v0  ;;  %485 = vmatpush.bf16.msra.mxu3 %v2942_v1  ;;  %v2962_v22 = vld [vmem:[%s5464_s0 + $0xf8] sm:$0xf0]  ;;  %v2983_v23 = vld [vmem:[%s5464_s0 + $0x118] sm:$0xf]  ;;  %v3908_v24 = vld [vmem:[%s5464_s0 + $0x11c] sm:$0xf0]  ;;  %v2961_v27 = vor.u32 %v3904_v18, %v2960_v17 }
  0x2a   :  { %v3907_v25 = vld [vmem:[%s5464_s0 + $0x11c] sm:$0xf]  ;;  %v2985_v26 = vld [vmem:[%s5464_s0 + $0x120] sm:$0xf0]  ;;  %506 = vperm.xlu0 %4057, %v4287_v15   ;;  %584 = vperm.xlu1 %4058, %v4287_v15   ;;  %v2965_v28 = vor.u32 %v3903_v21, %v2962_v22  ;;  %v2984_v29 = vor.u32 %v3908_v24, %v2983_v23  ;;  %v340_v31 = vld [vmem:[%s5465_s1] sm:$0xf] }
  0x2b   :  { %v2988_v30 = vor.u32 %v3907_v25, %v2985_v26  ;;  %v496_v32 = vld [vmem:[%s5465_s1] sm:$0xf]  ;;  %v3934_v34 = vld [vmem:[%s5467_s3 + $0xb8] sm:$0xff]  ;;  %v3933_v38 = vld [vmem:[%s5467_s3 + $0xb0] sm:$0xff]  ;;  %vm782_vm2 = vcmask 1041409   ;;  %vm785_vm3 = vcmask 1042434  }
  0x2c   :  { %548 = vmatpush.bf16.msrb.mxu0 %v538_v6  ;;  %561 = vmatpush.bf16.msrb.mxu1 %v541_v7  ;;  %v574_v33 = vld [vmem:[%s5465_s1] sm:$0xf]  ;;  %v3942_v35 = vld [vmem:[%s5467_s3 + $0xf8] sm:$0xff]  ;;  %v3941_v39 = vld [vmem:[%s5467_s3 + $0xf0] sm:$0xff]  ;;  %vm788_vm4 = vcmask 1043459   ;;  %vm791_vm5 = vcmask 1044484  }
  0x2d   :  { %626 = vmatpush.bf16.msrb.mxu2 %v616_v10  ;;  %639 = vmatpush.bf16.msrb.mxu3 %v619_v11  ;;  %v3918_v36 = vld [vmem:[%s5467_s3 + $0x38] sm:$0xff]  ;;  %v3917_v40 = vld [vmem:[%s5467_s3 + $0x30] sm:$0xff]  ;;  %v3932_v42 = vld [vmem:[%s5467_s3 + $0xa8] sm:$0xff]  ;;  %vm794_vm6 = vcmask 1045509   ;;  %vm797_vm7 = vcmask 1046534   ;;  %vm800_vm8 = vcmask 1047559  }
  0x2e   :  { %428 = vperm.xlu2 %4059, %v4287_v15   ;;  %v418_v15 = vld [vmem:[%s5465_s1] sm:$0xf]  ;;  %v3926_v37 = vld [vmem:[%s5467_s3 + $0x78] sm:$0xff]  ;;  %v3925_v41 = vld [vmem:[%s5467_s3 + $0x70] sm:$0xff]  ;;  %vm2536_vm9 = vcmask 261120   ;;  %s2811_s29 = sshll.u32 %s5471_s7, 4  ;;  %s2812_s29 = int_to_ptr.hbm [resolvable:$true] %s2811_s29 }
  0x2f   :  { %v3940_v43 = vld [vmem:[%s5467_s3 + $0xe8] sm:$0xff]  ;;  %v3931_v47 = vld [vmem:[%s5467_s3 + $0xa0] sm:$0xff]  ;;  %v3930_v57 = vld [vmem:[%s5467_s3 + $0x98] sm:$0xff] }
  0x30   :  { %549 = vmatpush.bf16.msrb.mxu0 %v2969_v14  ;;  %562 = vmatpush.bf16.msrb.mxu1 %v2973_v16  ;;  %v3916_v44 = vld [vmem:[%s5467_s3 + $0x28] sm:$0xff]  ;;  %v3939_v48 = vld [vmem:[%s5467_s3 + $0xe0] sm:$0xff]  ;;  %v3938_v58 = vld [vmem:[%s5467_s3 + $0xd8] sm:$0xff] }
  0x31   :  { %627 = vmatpush.bf16.msrb.mxu2 %v2992_v19  ;;  %640 = vmatpush.bf16.msrb.mxu3 %v2996_v20  ;;  %v3924_v45 = vld [vmem:[%s5467_s3 + $0x68] sm:$0xff]  ;;  %v3915_v49 = vld [vmem:[%s5467_s3 + $0x20] sm:$0xff]  ;;  %v3914_v59 = vld [vmem:[%s5467_s3 + $0x18] sm:$0xff] }
  0x32   :  { %v3923_v52 = vld [vmem:[%s5467_s3 + $0x60] sm:$0xff]  ;;  %v3922_v60 = vld [vmem:[%s5467_s3 + $0x58] sm:$0xff]  ;;  %v3929_v1 = vld [vmem:[%s5467_s3 + $0x90] sm:$0xff] }
  0x33   :  { %v3937_v2 = vld [vmem:[%s5467_s3 + $0xd0] sm:$0xff]  ;;  %v3928_v11 = vld [vmem:[%s5467_s3 + $0x88] sm:$0xff]  ;;  %v3927_v20 = vld [vmem:[%s5467_s3 + $0x80] sm:$0xff] }
  0x34   :  { %550 = vmatpush.bf16.msrb.mxu0 %v2961_v27  ;;  %563 = vmatpush.bf16.msrb.mxu1 %v2965_v28  ;;  %v3913_v3 = vld [vmem:[%s5467_s3 + $0x10] sm:$0xff]  ;;  %v3936_v12 = vld [vmem:[%s5467_s3 + $0xc8] sm:$0xff]  ;;  %v3935_v21 = vld [vmem:[%s5467_s3 + $0xc0] sm:$0xff] }
  0x35   :  { %628 = vmatpush.bf16.msrb.mxu2 %v2984_v29  ;;  %641 = vmatpush.bf16.msrb.mxu3 %v2988_v30  ;;  %v3921_v8 = vld [vmem:[%s5467_s3 + $0x50] sm:$0xff]  ;;  %v3912_v13 = vld [vmem:[%s5467_s3 + $0x8] sm:$0xff]  ;;  %v3911_v22 = vld [vmem:[%s5467_s3] sm:$0xff] }
  0x36   :  { %2928 = vmatmul.msk.bf16.vlgmr.msra.gmra.mxu0 %vm65_vm1, %v340_v31  ;;  %2929 = vmatmul.msk.bf16.vlgmr.msra.gmra.mxu1 %vm65_vm1, %v340_v31  ;;  %v3920_v16 = vld [vmem:[%s5467_s3 + $0x48] sm:$0xff]  ;;  %v3919_v25 = vld [vmem:[%s5467_s3 + $0x40] sm:$0xff]  ;;  %v3950_v26 = vld [vmem:[%s5467_s3 + $0x138] sm:$0xff] }
  0x37   :  { %2951 = vmatmul.msk.bf16.vlgmr.msra.gmra.mxu2 %vm65_vm1, %v418_v15  ;;  %2952 = vmatmul.msk.bf16.vlgmr.msra.gmra.mxu3 %vm65_vm1, %v418_v15  ;;  %v3958_v27 = vld [vmem:[%s5467_s3 + $0x178] sm:$0xff] }
  0x38   :  { %916 = vmatpush.bf16.msra.mxu0 %v3934_v34  ;;  %929 = vmatpush.bf16.msra.mxu1 %v3942_v35  ;;  %v3966_v30 = vld [vmem:[%s5467_s3 + $0x1b8] sm:$0xff]  ;;  %v3949_v35 = vld [vmem:[%s5467_s3 + $0x130] sm:$0xff] }
  0x39   :  { %1070 = vmatpush.bf16.msra.mxu2 %v3918_v36  ;;  %1083 = vmatpush.bf16.msra.mxu3 %v3926_v37  ;;  %v3974_v31 = vld [vmem:[%s5467_s3 + $0x1f8] sm:$0xff]  ;;  %v3957_v36 = vld [vmem:[%s5467_s3 + $0x170] sm:$0xff] }
  0x3a   :  { %v3965_v37 = vld [vmem:[%s5467_s3 + $0x1b0] sm:$0xff] }
  0x3c   :  { %917 = vmatpush.bf16.msra.mxu0 %v3933_v38  ;;  %930 = vmatpush.bf16.msra.mxu1 %v3941_v39 }
  0x3d   :  { %1071 = vmatpush.bf16.msra.mxu2 %v3917_v40  ;;  %1084 = vmatpush.bf16.msra.mxu3 %v3925_v41  ;;  %v3973_v40 = vld [vmem:[%s5467_s3 + $0x1f0] sm:$0xff] }
  0x40   :  { %918 = vmatpush.bf16.msra.mxu0 %v3932_v42  ;;  %931 = vmatpush.bf16.msra.mxu1 %v3940_v43 }
  0x41   :  { %1072 = vmatpush.bf16.msra.mxu2 %v3916_v44  ;;  %1085 = vmatpush.bf16.msra.mxu3 %v3924_v45 }
  0x44   :  { %919 = vmatpush.bf16.msra.mxu0 %v3931_v47  ;;  %932 = vmatpush.bf16.msra.mxu1 %v3939_v48 }
  0x45   :  { %1073 = vmatpush.bf16.msra.mxu2 %v3915_v49  ;;  %1086 = vmatpush.bf16.msra.mxu3 %v3923_v52  ;;  %v3964_v52 = vld [vmem:[%s5467_s3 + $0x1a8] sm:$0xff] }
  0x46   :  { %2974 = vmatmul.msk.bf16.vlgmr.msrb.gmra.mxu0 %vm65_vm1, %v496_v32  ;;  %2975 = vmatmul.msk.bf16.vlgmr.msrb.gmra.mxu1 %vm65_vm1, %v496_v32 }
  0x47   :  { %2997 = vmatmul.msk.bf16.vlgmr.msrb.gmra.mxu2 %vm65_vm1, %v574_v33  ;;  %2998 = vmatmul.msk.bf16.vlgmr.msrb.gmra.mxu3 %vm65_vm1, %v574_v33 }
  0x48   :  { %920 = vmatpush.bf16.msra.mxu0 %v3930_v57  ;;  %933 = vmatpush.bf16.msra.mxu1 %v3938_v58 }
  0x49   :  { %1074 = vmatpush.bf16.msra.mxu2 %v3914_v59  ;;  %1087 = vmatpush.bf16.msra.mxu3 %v3922_v60 }
  0x4c   :  { %921 = vmatpush.bf16.msra.mxu0 %v3929_v1  ;;  %934 = vmatpush.bf16.msra.mxu1 %v3937_v2  ;;  %v3947_v2 = vld [vmem:[%s5467_s3 + $0x120] sm:$0xff] }
  0x4d   :  { %1075 = vmatpush.bf16.msra.mxu2 %v3913_v3  ;;  %1088 = vmatpush.bf16.msra.mxu3 %v3921_v8  ;;  %v3955_v3 = vld [vmem:[%s5467_s3 + $0x160] sm:$0xff] }
  0x4e   :  { %v3971_v8 = vld [vmem:[%s5467_s3 + $0x1e0] sm:$0xff] }
  0x50   :  { %922 = vmatpush.bf16.msra.mxu0 %v3928_v11  ;;  %935 = vmatpush.bf16.msra.mxu1 %v3936_v12 }
  0x51   :  { %1076 = vmatpush.bf16.msra.mxu2 %v3912_v13  ;;  %1089 = vmatpush.bf16.msra.mxu3 %v3920_v16  ;;  %v3946_v16 = vld [vmem:[%s5467_s3 + $0x118] sm:$0xff] }
  0x54   :  { %923 = vmatpush.bf16.msra.mxu0 %v3927_v20  ;;  %936 = vmatpush.bf16.msra.mxu1 %v3935_v21 }
  0x55   :  { %1077 = vmatpush.bf16.msra.mxu2 %v3911_v22  ;;  %1090 = vmatpush.bf16.msra.mxu3 %v3919_v25 }
  0x58   :  { %1321 = vmatpush.bf16.msrb.mxu0 %v3950_v26  ;;  %1334 = vmatpush.bf16.msrb.mxu1 %v3958_v27 }
  0x59   :  { %1509 = vmatpush.bf16.msrb.mxu2 %v3966_v30  ;;  %1522 = vmatpush.bf16.msrb.mxu3 %v3974_v31 }
  0x5c   :  { %1322 = vmatpush.bf16.msrb.mxu0 %v3949_v35  ;;  %1335 = vmatpush.bf16.msrb.mxu1 %v3957_v36 }
  0x5d   :  { %1510 = vmatpush.bf16.msrb.mxu2 %v3965_v37  ;;  %1523 = vmatpush.bf16.msrb.mxu3 %v3973_v40  ;;  %v3953_v40 = vld [vmem:[%s5467_s3 + $0x150] sm:$0xff] }
  0x61   :  { %1511 = vmatpush.bf16.msrb.mxu2 %v3964_v52 }
  0x7e   :  { %v351_v60 = vpop.permute.xlu2 %350 }
  0x88   :  { %v38_v46 = vpop.permute.xlu1 %37  ;;  %v117_v62 = vpop.permute.xlu0 %116 }
  0x8f   :  { %v85_v50 = vpop.f32.mrf.mxu0  ;;  %v98_v51 = vpop.f32.mrf.mxu1 }
  0x90   :  { %v86_v53 = vadd.f32 %v85_v50, %v38_v46  ;;  %v99_v54 = vadd.f32 %v98_v51, %v38_v46  ;;  %v195_v17 = vpop.permute.xlu0 %194  ;;  %v273_v39 = vpop.permute.xlu1 %272  ;;  %v3948_v50 = vld [vmem:[%s5467_s3 + $0x128] sm:$0xff] }
  0x91   :  { %v3956_v51 = vld [vmem:[%s5467_s3 + $0x168] sm:$0xff]  ;;  %1323 = vmatpush.bf16.msrb.mxu0 %v3948_v50 }
  0x92   :  { %v102_v55 = vmax.f32 %v86_v53, 0.0  ;;  %v103_v56 = vmax.f32 %v99_v54, 0.0  ;;  %v3972_v53 = vld [vmem:[%s5467_s3 + $0x1e8] sm:$0xff]  ;;  %1336 = vmatpush.bf16.msrb.mxu1 %v3956_v51  ;;  %v429_v51 = vpop.permute.xlu2 %428 }
  0x93   :  { %1524 = vmatpush.bf16.msrb.mxu3 %v3972_v53 }
  0x94   :  { %v104_v61 = vpack.c.bf16 %v103_v56, %v102_v55 }
  0x95   :  { %1324 = vmatpush.bf16.msrb.mxu0 %v3947_v2 }
  0x96   :  { %105 = vst [vmem:[#allocation2 + $0x30] sm:$0xff] %v104_v61  ;;  %1337 = vmatpush.bf16.msrb.mxu1 %v3955_v3  ;;  %v3944_v3 = vld [vmem:[%s5467_s3 + $0x108] sm:$0xff] }
  0x97   :  { %v162_v63 = vpop.f32.mrf.mxu2  ;;  %v175_v0 = vpop.f32.mrf.mxu3  ;;  %1525 = vmatpush.bf16.msrb.mxu3 %v3971_v8 }
  0x98   :  { %v163_v4 = vadd.f32 %v162_v63, %v117_v62  ;;  %v176_v5 = vadd.f32 %v175_v0, %v117_v62  ;;  %v87_v6 = vpop.f32.mrf.mxu0  ;;  %v100_v7 = vpop.f32.mrf.mxu1 }
  0x99   :  { %1325 = vmatpush.bf16.msrb.mxu0 %v3946_v16  ;;  %v3960_v16 = vld [vmem:[%s5467_s3 + $0x188] sm:$0xff] }
  0x9a   :  { %v179_v9 = vmax.f32 %v163_v4, 0.0  ;;  %v180_v10 = vmax.f32 %v176_v5, 0.0  ;;  %v3963_v4 = vld [vmem:[%s5467_s3 + $0x1a0] sm:$0xff] }
  0x9b   :  { %1512 = vmatpush.bf16.msrb.mxu2 %v3963_v4  ;;  %v3952_v4 = vld [vmem:[%s5467_s3 + $0x148] sm:$0xff] }
  0x9c   :  { %v181_v14 = vpack.c.bf16 %v180_v10, %v179_v9 }
  0x9d   :  { %v652_v33 = vld [vmem:[#allocation2 + $0x30] sm:$0x11]  ;;  %v1096_v34 = vld [vmem:[#allocation2 + $0x30] sm:$0x22]  ;;  %v4578_v55 = vld [vmem:[#allocation2 + $0x30] sm:$0x44] }
  0x9e   :  { %183 = vst [vmem:[#allocation2] sm:$0xff] %v181_v14  ;;  %v733_v43 = vunpack.c.l.b16 %v652_v33  ;;  %v734_v44 = vunpack.c.h.b16 %v652_v33  ;;  %v1145_v45 = vunpack.c.l.b16 %v1096_v34  ;;  %v1146_v59 = vunpack.c.h.b16 %v1096_v34 }
  0x9f   :  { %v164_v18 = vpop.f32.mrf.mxu2  ;;  %v177_v19 = vpop.f32.mrf.mxu3  ;;  %v1585_v7 = vunpack.c.l.b16 %v4578_v55  ;;  %v1586_v20 = vunpack.c.h.b16 %v4578_v55 }
  0xa0   :  { %v4580_v61 = vunpack.i.l.s16 %v733_v43  ;;  %v4582_v62 = vunpack.i.l.s16 %v734_v44  ;;  %v4584_v63 = vunpack.i.l.s16 %v1145_v45  ;;  %v4601_v11 = vunpack.i.l.s16 %v1146_v59  ;;  %v3961_v43 = vld [vmem:[%s5467_s3 + $0x190] sm:$0xff] }
  0xa1   :  { %v3969_v44 = vld [vmem:[%s5467_s3 + $0x1d0] sm:$0xff] }
  0xa2   :  { %v781_v18 = vrot.slane %v4580_v61, 1  ;;  %v802_v19 = vrot.slane %v4582_v62, 1  ;;  %v1207_v33 = vrot.slane %v4601_v11, 2  ;;  %v1381_v34 = vrot.slane %v4584_v63, 3 }
  0xa3   :  { %v240_v23 = vpop.f32.mrf.mxu0  ;;  %v253_v24 = vpop.f32.mrf.mxu1  ;;  %v1395_v35 = vrot.slane %v4601_v11, 3 }
  0xa4   :  { %v241_v28 = vadd.f32 %v240_v23, %v195_v17  ;;  %v254_v29 = vadd.f32 %v253_v24, %v195_v17  ;;  %v3954_v17 = vld [vmem:[%s5467_s3 + $0x158] sm:$0xff] }
  0xa5   :  { %v653_v54 = vld [vmem:[#allocation2] sm:$0x11]  ;;  %v1097_v58 = vld [vmem:[#allocation2] sm:$0x22]  ;;  %v4586_v0 = vld [vmem:[#allocation2] sm:$0x44]  ;;  %1338 = vmatpush.bf16.msrb.mxu1 %v3954_v17 }
  0xa6   :  { %v257_v15 = vmax.f32 %v241_v28, 0.0  ;;  %v258_v32 = vmax.f32 %v254_v29, 0.0  ;;  %v735_v5 = vunpack.c.l.b16 %v653_v54  ;;  %v736_v6 = vunpack.c.h.b16 %v653_v54  ;;  %v3962_v23 = vld [vmem:[%s5467_s3 + $0x198] sm:$0xff]  ;;  %v3968_v17 = vld [vmem:[%s5467_s3 + $0x1c8] sm:$0xff] }
  0xa7   :  { %v1147_v9 = vunpack.c.l.b16 %v1097_v58  ;;  %v1148_v10 = vunpack.c.h.b16 %v1097_v58  ;;  %v1587_v12 = vunpack.c.l.b16 %v4586_v0  ;;  %v3970_v24 = vld [vmem:[%s5467_s3 + $0x1d8] sm:$0xff]  ;;  %v1193_v28 = vrot.slane %v4584_v63, 2  ;;  %1513 = vmatpush.bf16.msrb.mxu2 %v3962_v23 }
  0xa8   :  { %v259_v38 = vpack.c.bf16 %v258_v32, %v257_v15  ;;  %v4619_v26 = vunpack.i.l.s16 %v735_v5  ;;  %v4621_v27 = vunpack.i.l.s16 %v736_v6  ;;  %v4624_v29 = vunpack.i.l.s16 %v1585_v7  ;;  %1526 = vmatpush.bf16.msrb.mxu3 %v3970_v24 }
  0xa9   :  { %v4626_v15 = vunpack.i.l.s16 %v1147_v9  ;;  %v4628_v32 = vunpack.i.l.s16 %v1148_v10  ;;  %v4633_v36 = vunpack.i.l.s16 %v1587_v12  ;;  %1339 = vmatpush.bf16.msrb.mxu1 %v3953_v40 }
  0xaa   :  { %261 = vst [vmem:[#allocation2 + $0x18] sm:$0xff] %v259_v38  ;;  %v318_v41 = vpop.f32.mrf.mxu2  ;;  %v331_v42 = vpop.f32.mrf.mxu3  ;;  %v4649_v45 = vsel %vm782_vm2, %v4619_v26, %v781_v18  ;;  %v956_v53 = vrot.slane %v4621_v27, 7 }
  0xab   :  { %v319_v46 = vadd.f32 %v318_v41, %v273_v39  ;;  %v332_v47 = vadd.f32 %v331_v42, %v273_v39  ;;  %v242_v48 = vpop.f32.mrf.mxu0  ;;  %v255_v49 = vpop.f32.mrf.mxu1  ;;  %v3945_v39 = vld [vmem:[%s5467_s3 + $0x110] sm:$0xff]  ;;  %v1194_v54 = vrot.slane %v4626_v15, 1  ;;  %v1382_v58 = vrot.slane %v4626_v15, 2  ;;  %1514 = vmatpush.bf16.msrb.mxu2 %v3961_v43 }
  0xac   :  { %v1633_v48 = vrot.slane %v4624_v29, 4  ;;  %v1588_v49 = vunpack.c.h.b16 %v4586_v0  ;;  %v1396_v59 = vrot.slane %v4628_v32, 2  ;;  %1326 = vmatpush.bf16.msrb.mxu0 %v3945_v39  ;;  %1527 = vmatpush.bf16.msrb.mxu3 %v3969_v44  ;;  %v507_v44 = vpop.permute.xlu0 %506 }
  0xad   :  { %v335_v56 = vmax.f32 %v319_v46, 0.0  ;;  %v336_v57 = vmax.f32 %v332_v47, 0.0  ;;  %v942_v46 = vrot.slane %v4619_v26, 7  ;;  %v1195_v23 = vsel %vm782_vm2, %v1194_v54, %v1193_v28  ;;  %1340 = vmatpush.bf16.msrb.mxu1 %v3952_v4 }
  0xae   :  { %v4727_v11 = vunpack.i.l.s16 %v1588_v49 }
  0xaf   :  { %v337_v1 = vpack.c.bf16 %v336_v57, %v335_v56  ;;  %v1208_v56 = vrot.slane %v4628_v32, 1  ;;  %v4659_v57 = vsel %vm782_vm2, %v4621_v27, %v802_v19  ;;  %v1383_v32 = vsel %vm782_vm2, %v1382_v58, %v1381_v34  ;;  %1515 = vmatpush.bf16.msrb.mxu2 %v3960_v16 }
  0xb0   :  { %1327 = vmatpush.bf16.msrb.mxu0 %v3944_v3  ;;  %1528 = vmatpush.bf16.msrb.mxu3 %v3968_v17  ;;  %v1397_v34 = vsel %vm782_vm2, %v1396_v59, %v1395_v35 }
  0xb1   :  { %339 = vst [vmem:[#allocation2 + $0x10] sm:$0xff] %v337_v1  ;;  %v654_v25 = vld [vmem:[#allocation2 + $0x18] sm:$0x11]  ;;  %v1098_v47 = vld [vmem:[#allocation2 + $0x18] sm:$0x22]  ;;  %v1209_v24 = vsel %vm782_vm2, %v1208_v56, %v1207_v33 }
  0xb2   :  { %v320_v13 = vpop.f32.mrf.mxu2  ;;  %v333_v14 = vpop.f32.mrf.mxu3  ;;  %v737_v41 = vunpack.c.l.b16 %v654_v25  ;;  %v738_v42 = vunpack.c.h.b16 %v654_v25  ;;  %v1149_v8 = vunpack.c.l.b16 %v1098_v47  ;;  %v1150_v9 = vunpack.c.h.b16 %v1098_v47  ;;  %v4734_v55 = vld [vmem:[#allocation2 + $0x18] sm:$0x44] }
  0xb3   :  { %v396_v21 = vpop.f32.mrf.mxu0  ;;  %v409_v22 = vpop.f32.mrf.mxu1 }
  0xb4   :  { %v397_v30 = vadd.f32 %v396_v21, %v351_v60  ;;  %v410_v31 = vadd.f32 %v409_v22, %v351_v60  ;;  %v1634_v60 = vrot.slane %v4633_v36, 3  ;;  %v4670_v5 = vunpack.i.l.s16 %v737_v41 }
  0xb5   :  { %v4672_v6 = vunpack.i.l.s16 %v738_v42  ;;  %v943_v21 = vsel %vm782_vm2, %v942_v46, %v4580_v61  ;;  %v957_v22 = vsel %vm782_vm2, %v956_v53, %v4582_v62  ;;  %v3951_v61 = vld [vmem:[%s5467_s3 + $0x140] sm:$0xff]  ;;  %v3211_v28 = vunpack.i.l.s16 %v1149_v8 }
  0xb6   :  { %v413_v37 = vmax.f32 %v397_v30, 0.0  ;;  %v414_v38 = vmax.f32 %v410_v31, 0.0  ;;  %v3943_v31 = vld [vmem:[%s5467_s3 + $0x100] sm:$0xff]  ;;  %v784_v62 = vrot.slane %v4670_v5, 7  ;;  %v4695_v15 = vunpack.i.l.s16 %v1150_v9  ;;  %1341 = vmatpush.bf16.msrb.mxu1 %v3951_v61 }
  0xb7   :  { %v804_v41 = vrot.slane %v4672_v6, 7  ;;  %v944_v42 = vrot.slane %v4670_v5, 6  ;;  %v958_v63 = vrot.slane %v4672_v6, 6  ;;  %v4715_v43 = vsel %vm782_vm2, %v1634_v60, %v1633_v48  ;;  %1328 = vmatpush.bf16.msrb.mxu0 %v3943_v31 }
  0xb8   :  { %v415_v50 = vpack.c.bf16 %v414_v38, %v413_v37  ;;  %v655_v52 = vld [vmem:[#allocation2 + $0x10] sm:$0x11]  ;;  %v1099_v7 = vld [vmem:[#allocation2 + $0x10] sm:$0x22]  ;;  %v3959_v37 = vld [vmem:[%s5467_s3 + $0x180] sm:$0xff]  ;;  %v786_v48 = vsel %vm785_vm3, %v784_v62, %v4649_v45  ;;  %v1210_v53 = vsel %vm785_vm3, %v4695_v15, %v1209_v24  ;;  %v1384_v54 = vrot.slane %v3211_v28, 1 }
  0xb9   :  { %v739_v18 = vunpack.c.l.b16 %v655_v52  ;;  %v740_v19 = vunpack.c.h.b16 %v655_v52  ;;  %v1151_v27 = vunpack.c.l.b16 %v1099_v7  ;;  %v1152_v30 = vunpack.c.h.b16 %v1099_v7  ;;  %v3967_v38 = vld [vmem:[%s5467_s3 + $0x1c0] sm:$0xff]  ;;  %1516 = vmatpush.bf16.msrb.mxu2 %v3959_v37 }
  0xba   :  { %417 = vst [vmem:[#allocation2 + $0x8] sm:$0xff] %v415_v50  ;;  %v474_v1 = vpop.f32.mrf.mxu2  ;;  %v487_v2 = vpop.f32.mrf.mxu3  ;;  %v4723_v50 = vunpack.i.l.s16 %v1586_v20  ;;  %v1196_v52 = vsel %vm785_vm3, %v3211_v28, %v1195_v23  ;;  %1529 = vmatpush.bf16.msrb.mxu3 %v3967_v38  ;;  %v805_v49 = vsel %vm785_vm3, %v804_v41, %v4659_v57  ;;  %v959_v3 = vsel %vm785_vm3, %v958_v63, %v957_v22 }
  0xbb   :  { %v475_v10 = vadd.f32 %v474_v1, %v429_v51  ;;  %v488_v12 = vadd.f32 %v487_v2, %v429_v51  ;;  %v398_v13 = vpop.f32.mrf.mxu0  ;;  %v411_v14 = vpop.f32.mrf.mxu1  ;;  %v3037_v39 = vunpack.i.l.s16 %v739_v18  ;;  %v3038_v40 = vunpack.i.l.s16 %v740_v19  ;;  %v4754_v18 = vld [vmem:[#allocation2 + $0x10] sm:$0x44] }
  0xbc   :  { %v4717_v46 = vunpack.i.l.s16 %v1151_v27  ;;  %v4719_v47 = vunpack.i.l.s16 %v1152_v30  ;;  %v945_v2 = vsel %vm785_vm3, %v944_v42, %v943_v21  ;;  %v1589_v8 = vunpack.c.l.b16 %v4734_v55  ;;  %v585_v27 = vpop.permute.xlu1 %584 }
  0xbd   :  { %v491_v25 = vmax.f32 %v475_v10, 0.0  ;;  %v492_v26 = vmax.f32 %v488_v12, 0.0  ;;  %v787_v0 = vrot.slane %v3037_v39, 6  ;;  %v806_v58 = vrot.slane %v3038_v40, 6 }
  0xbe   :  { %v946_v59 = vrot.slane %v3037_v39, 5  ;;  %v960_v4 = vrot.slane %v3038_v40, 5  ;;  %v1197_v6 = vrot.slane %v4717_v46, 7  ;;  %v1211_v7 = vrot.slane %v4719_v47, 7 }
  0xbf   :  { %v493_v33 = vpack.c.bf16 %v492_v26, %v491_v25  ;;  %v1385_v57 = vsel %vm785_vm3, %v1384_v54, %v1383_v32  ;;  %v1398_v12 = vrot.slane %v4695_v15, 1  ;;  %v4746_v14 = vsel %vm788_vm4, %v787_v0, %v786_v48 }
  0xc0   :  { %v4749_v16 = vsel %vm788_vm4, %v806_v58, %v805_v49  ;;  %v4752_v17 = vsel %vm788_vm4, %v946_v59, %v945_v2  ;;  %v961_v30 = vsel %vm788_vm4, %v960_v4, %v959_v3  ;;  %v4760_v31 = vsel %vm788_vm4, %v1197_v6, %v1196_v52 }
  0xc1   :  { %495 = vst [vmem:[#allocation2 + $0x20] sm:$0xff] %v493_v33  ;;  %v656_v1 = vld [vmem:[#allocation2 + $0x8] sm:$0x11]  ;;  %v1100_v5 = vld [vmem:[#allocation2 + $0x8] sm:$0x22]  ;;  %v4763_v61 = vsel %vm788_vm4, %v1211_v7, %v1210_v53  ;;  %v4765_v62 = vunpack.i.l.s16 %v1589_v8  ;;  %v1399_v37 = vsel %vm785_vm3, %v1398_v12, %v1397_v34  ;;  %v1591_v38 = vunpack.c.l.b16 %v4754_v18 }
  0xc2   :  { %v476_v35 = vpop.f32.mrf.mxu2  ;;  %v489_v51 = vpop.f32.mrf.mxu3  ;;  %v741_v13 = vunpack.c.l.b16 %v656_v1  ;;  %v742_v22 = vunpack.c.h.b16 %v656_v1  ;;  %v1153_v24 = vunpack.c.l.b16 %v1100_v5  ;;  %v1154_v25 = vunpack.c.h.b16 %v1100_v5  ;;  %v4756_v26 = vld [vmem:[#allocation2 + $0x8] sm:$0x44] }
  0xc3   :  { %v552_v20 = vpop.f32.mrf.mxu0  ;;  %v565_v56 = vpop.f32.mrf.mxu1  ;;  %v1636_v34 = vrot.slane %v4765_v62, 2  ;;  %v1386_v49 = vsel %vm788_vm4, %v4717_v46, %v1385_v57  ;;  %v4777_v58 = vsel %vm788_vm4, %v4719_v47, %v1399_v37 }
  0xc4   :  { %v553_v60 = vadd.f32 %v552_v20, %v507_v44  ;;  %v566_v45 = vadd.f32 %v565_v56, %v507_v44  ;;  %v1593_v44 = vunpack.c.l.b16 %v4756_v26  ;;  %v3039_v35 = vunpack.i.l.s16 %v741_v13 }
  0xc5   :  { %v3040_v51 = vunpack.i.l.s16 %v742_v22  ;;  %v3215_v48 = vunpack.i.l.s16 %v1153_v24  ;;  %v4770_v52 = vunpack.i.l.s16 %v1154_v25  ;;  %v4790_v47 = vsel %vm785_vm3, %v1636_v34, %v4715_v43 }
  0xc6   :  { %v569_v9 = vmax.f32 %v553_v60, 0.0  ;;  %v570_v10 = vmax.f32 %v566_v45, 0.0  ;;  %v4781_v45 = vunpack.i.l.s16 %v1591_v38  ;;  %v4783_v1 = vunpack.i.l.s16 %v1593_v44 }
  0xc7   :  { %v790_v2 = vrot.slane %v3039_v35, 5  ;;  %v808_v3 = vrot.slane %v3040_v51, 5  ;;  %v948_v4 = vrot.slane %v3039_v35, 4  ;;  %v962_v5 = vrot.slane %v3040_v51, 4 }
  0xc8   :  { %v571_v19 = vpack.c.bf16 %v570_v10, %v569_v9  ;;  %v657_v21 = vld [vmem:[#allocation2 + $0x20] sm:$0x11]  ;;  %v1101_v23 = vld [vmem:[#allocation2 + $0x20] sm:$0x22]  ;;  %v1199_v7 = vrot.slane %v3215_v48, 6  ;;  %v1213_v46 = vrot.slane %v4770_v52, 6 }
  0xc9   :  { %v743_v32 = vunpack.c.l.b16 %v657_v21  ;;  %v744_v33 = vunpack.c.h.b16 %v657_v21  ;;  %v1155_v63 = vunpack.c.l.b16 %v1101_v23  ;;  %v1156_v20 = vunpack.c.h.b16 %v1101_v23 }
  0xca   :  { %573 = vst [vmem:[#allocation2 + $0x28] sm:$0xff] %v571_v19  ;;  %v630_v28 = vpop.f32.mrf.mxu2  ;;  %v643_v15 = vpop.f32.mrf.mxu3  ;;  %v1387_v24 = vrot.slane %v3215_v48, 7  ;;  %v809_v43 = vsel %vm791_vm5, %v808_v3, %v4749_v16  ;;  %v1200_v37 = vsel %vm791_vm5, %v1199_v7, %v4760_v31  ;;  %v1214_v38 = vsel %vm791_vm5, %v1213_v46, %v4763_v61 }
  0xcb   :  { %v631_v39 = vadd.f32 %v630_v28, %v585_v27  ;;  %v644_v40 = vadd.f32 %v643_v15, %v585_v27  ;;  %v554_v41 = vpop.f32.mrf.mxu0  ;;  %v567_v42 = vpop.f32.mrf.mxu1  ;;  %v3041_v56 = vunpack.i.l.s16 %v743_v32  ;;  %v3042_v0 = vunpack.i.l.s16 %v744_v33 }
  0xcc   :  { %v4779_v60 = vunpack.i.l.s16 %v1155_v63  ;;  %v4785_v8 = vunpack.i.l.s16 %v1156_v20  ;;  %v792_v27 = vsel %vm791_vm5, %v790_v2, %v4746_v14  ;;  %v949_v15 = vsel %vm791_vm5, %v948_v4, %v4752_v17  ;;  %v4808_v41 = vld [vmem:[#allocation2 + $0x20] sm:$0x44] }
  0xcd   :  { %v647_v53 = vmax.f32 %v631_v39, 0.0  ;;  %v648_v54 = vmax.f32 %v644_v40, 0.0  ;;  %v793_v12 = vrot.slane %v3041_v56, 4  ;;  %v810_v19 = vrot.slane %v3042_v0, 4 }
  0xce   :  { %v950_v21 = vrot.slane %v3041_v56, 3  ;;  %v964_v22 = vrot.slane %v3042_v0, 3  ;;  %v1201_v23 = vrot.slane %v4779_v60, 5  ;;  %v963_v32 = vsel %vm791_vm5, %v962_v5, %v961_v30 }
  0xcf   :  { %v649_v59 = vpack.c.bf16 %v648_v54, %v647_v53  ;;  %v795_v39 = vsel %vm794_vm6, %v793_v12, %v792_v27  ;;  %v811_v14 = vsel %vm794_vm6, %v810_v19, %v809_v43  ;;  %v1215_v40 = vrot.slane %v4785_v8, 5 }
  0xd0   :  { %v1401_v16 = vrot.slane %v4770_v52, 7  ;;  %v951_v17 = vsel %vm794_vm6, %v950_v21, %v949_v15  ;;  %v965_v30 = vsel %vm794_vm6, %v964_v22, %v963_v32  ;;  %v4813_v31 = vsel %vm794_vm6, %v1201_v23, %v1200_v37  ;;  %v3990_v37 = vld [vmem:[%s5467_s3 + $0x278] sm:$0xff] }
  0xd1   :  { %651 = vst [vmem:[#allocation2 + $0x38] sm:$0xff] %v649_v59  ;;  %v658_v6 = vld [vmem:[#allocation2 + $0x28] sm:$0x11]  ;;  %v1102_v33 = vld [vmem:[#allocation2 + $0x28] sm:$0x22]  ;;  %v1388_v61 = vsel %vm791_vm5, %v1387_v24, %v1386_v49  ;;  %v1389_v20 = vrot.slane %v4779_v60, 6  ;;  %v1595_v34 = vunpack.c.l.b16 %v4808_v41 }
  0xd2   :  { %v632_v9 = vpop.f32.mrf.mxu2  ;;  %v645_v10 = vpop.f32.mrf.mxu3  ;;  %v745_v57 = vunpack.c.l.b16 %v658_v6  ;;  %v746_v13 = vunpack.c.h.b16 %v658_v6  ;;  %v4816_v42 = vld [vmem:[#allocation2 + $0x28] sm:$0x44]  ;;  %v1157_v48 = vunpack.c.l.b16 %v1102_v33  ;;  %v1158_v53 = vunpack.c.h.b16 %v1102_v33  ;;  %v3982_v33 = vld [vmem:[%s5467_s3 + $0x238] sm:$0xff] }
  0xd3   :  { %v1403_v4 = vrot.slane %v4785_v8, 6  ;;  %v1597_v5 = vunpack.c.l.b16 %v4816_v42 }
  0xd4   :  { %v3043_v25 = vunpack.i.l.s16 %v745_v57  ;;  %v3044_v28 = vunpack.i.l.s16 %v746_v13  ;;  %v3219_v46 = vunpack.i.l.s16 %v1157_v48  ;;  %v3220_v9 = vunpack.i.l.s16 %v1158_v53 }
  0xd6   :  { %v796_v44 = vrot.slane %v3043_v25, 3  ;;  %v812_v35 = vrot.slane %v3044_v28, 3  ;;  %v952_v56 = vrot.slane %v3043_v25, 2  ;;  %v966_v0 = vrot.slane %v3044_v28, 2 }
  0xd7   :  { %v1405_v48 = vrot.slane %v3220_v9, 5 }
  0xd8   :  { %v659_v63 = vld [vmem:[#allocation2 + $0x38] sm:$0x11]  ;;  %v1103_v51 = vld [vmem:[#allocation2 + $0x38] sm:$0x22]  ;;  %v798_v6 = vsel %vm797_vm7, %v796_v44, %v795_v39  ;;  %v813_v7 = vsel %vm797_vm7, %v812_v35, %v811_v14  ;;  %v953_v13 = vsel %vm797_vm7, %v952_v56, %v951_v17  ;;  %v967_v19 = vsel %vm797_vm7, %v966_v0, %v965_v30  ;;  %v4832_v27 = vld [vmem:[#allocation2 + $0x38] sm:$0x44] }
  0xd9   :  { %v747_v52 = vunpack.c.l.b16 %v659_v63  ;;  %v748_v54 = vunpack.c.h.b16 %v659_v63  ;;  %v1159_v59 = vunpack.c.l.b16 %v1103_v51  ;;  %v1160_v2 = vunpack.c.h.b16 %v1103_v51  ;;  %v3998_v39 = vld [vmem:[%s5467_s3 + $0x2b8] sm:$0xff] }
  0xda   :  { %v4006_v14 = vld [vmem:[%s5467_s3 + $0x2f8] sm:$0xff]  ;;  %v1203_v17 = vrot.slane %v3219_v46, 4  ;;  %v1216_v30 = vsel %vm794_vm6, %v1215_v40, %v1214_v38  ;;  %v1402_v63 = vsel %vm791_vm5, %v1401_v16, %v4777_v58  ;;  %v4849_v44 = vunpack.i.l.s16 %v1595_v34  ;;  %v3981_v58 = vld [vmem:[%s5467_s3 + $0x230] sm:$0xff] }
  0xdb   :  { %v3045_v3 = vunpack.i.l.s16 %v747_v52  ;;  %v3046_v49 = vunpack.i.l.s16 %v748_v54  ;;  %v3221_v21 = vunpack.i.l.s16 %v1159_v59  ;;  %v4826_v22 = vunpack.i.l.s16 %v1160_v2  ;;  %v3989_v40 = vld [vmem:[%s5467_s3 + $0x270] sm:$0xff] }
  0xdc   :  { %v1217_v35 = vrot.slane %v3220_v9, 4  ;;  %v1391_v51 = vrot.slane %v3219_v46, 5  ;;  %v1599_v53 = vunpack.c.l.b16 %v4832_v27  ;;  %v1390_v54 = vsel %vm794_vm6, %v1389_v20, %v1388_v61  ;;  %v4005_v20 = vld [vmem:[%s5467_s3 + $0x2f0] sm:$0xff] }
  0xdd   :  { %v799_v10 = vrot.slane %v3045_v3, 2  ;;  %v814_v60 = vrot.slane %v3046_v49, 2  ;;  %v954_v57 = vrot.slane %v3045_v3, 1  ;;  %v968_v12 = vrot.slane %v3046_v49, 1 }
  0xde   :  { %v1205_v52 = vrot.slane %v3221_v21, 3  ;;  %v1638_v56 = vrot.slane %v4781_v45, 1  ;;  %v1590_v38 = vunpack.c.h.b16 %v4734_v55  ;;  %v1219_v16 = vrot.slane %v4826_v22, 3  ;;  %v3997_v55 = vld [vmem:[%s5467_s3 + $0x2b0] sm:$0xff] }
  0xdf   :  { %v801_v8 = vsel %vm800_vm8, %v799_v10, %v798_v6  ;;  %v815_v23 = vsel %vm800_vm8, %v814_v60, %v813_v7  ;;  %v955_v24 = vsel %vm800_vm8, %v954_v57, %v953_v13  ;;  %v969_v25 = vsel %vm800_vm8, %v968_v12, %v967_v19  ;;  %v3988_v60 = vld [vmem:[%s5467_s3 + $0x268] sm:$0xff] }
  0xe0   :  { %v816_v28 = vpack.c.b16 %v801_v8, %v801_v8  ;;  %v817_v43 = vpack.c.b16 %v815_v23, %v815_v23  ;;  %v970_v15 = vpack.c.b16 %v955_v24, %v955_v24  ;;  %v971_v32 = vpack.c.b16 %v969_v25, %v969_v25  ;;  %v4004_v13 = vld [vmem:[%s5467_s3 + $0x2e8] sm:$0xff] }
  0xe1   :  { %v1393_v34 = vrot.slane %v3221_v21, 4  ;;  %v1404_v0 = vsel %vm794_vm6, %v1403_v4, %v1402_v63  ;;  %v4863_v61 = vunpack.i.l.s16 %v1597_v5  ;;  %v1204_v59 = vsel %vm797_vm7, %v1203_v17, %v4813_v31  ;;  %v4003_v63 = vld [vmem:[%s5467_s3 + $0x2e0] sm:$0xff] }
  0xe2   :  { %924 = vmatmul.bf16.vlgmr.msra.gmra.mxu0 %v816_v28  ;;  %937 = vmatmul.bf16.vlgmr.msra.gmra.mxu1 %v817_v43  ;;  %v1407_v2 = vrot.slane %v4826_v22, 4  ;;  %v1641_v3 = vrot.slane %v4849_v44, 7  ;;  %v1592_v49 = vunpack.c.h.b16 %v4754_v18  ;;  %v1218_v4 = vsel %vm797_vm7, %v1217_v35, %v1216_v30  ;;  %v3980_v18 = vld [vmem:[%s5467_s3 + $0x228] sm:$0xff]  ;;  %v3995_v30 = vld [vmem:[%s5467_s3 + $0x2a0] sm:$0xff] }
  0xe3   :  { %1078 = vmatmul.bf16.vlgmr.msra.gmra.mxu2 %v970_v15  ;;  %1091 = vmatmul.bf16.vlgmr.msra.gmra.mxu3 %v971_v32  ;;  %v1392_v5 = vsel %vm797_vm7, %v1391_v51, %v1390_v54  ;;  %v1406_v6 = vsel %vm797_vm7, %v1405_v48, %v1404_v0  ;;  %v4879_v7 = vunpack.i.l.s16 %v1599_v53  ;;  %v4882_v46 = vsel %vm800_vm8, %v1205_v52, %v1204_v59  ;;  %v4002_v59 = vld [vmem:[%s5467_s3 + $0x2d8] sm:$0xff] }
  0xe4   :  { %1761 = vmatpush.bf16.msra.mxu0 %v3982_v33  ;;  %1774 = vmatpush.bf16.msra.mxu1 %v3990_v37  ;;  %v1639_v31 = vsel %vm788_vm4, %v1638_v56, %v4790_v47  ;;  %v1596_v9 = vunpack.c.h.b16 %v4808_v41  ;;  %v1598_v10 = vunpack.c.h.b16 %v4816_v42  ;;  %v1220_v57 = vsel %vm800_vm8, %v1219_v16, %v1218_v4  ;;  %v3996_v42 = vld [vmem:[%s5467_s3 + $0x2a8] sm:$0xff]  ;;  %v3987_v37 = vld [vmem:[%s5467_s3 + $0x260] sm:$0xff] }
  0xe5   :  { %1949 = vmatpush.bf16.msra.mxu2 %v3998_v39  ;;  %1962 = vmatpush.bf16.msra.mxu3 %v4006_v14  ;;  %v4896_v12 = vsel %vm800_vm8, %v1393_v34, %v1392_v5  ;;  %v1643_v47 = vrot.slane %v4863_v61, 6  ;;  %v4899_v41 = vunpack.i.l.s16 %v1590_v38  ;;  %v1408_v19 = vsel %vm800_vm8, %v1407_v2, %v1406_v6 }
  0xe6   :  { %v1640_v21 = vsel %vm791_vm5, %v4783_v1, %v1639_v31  ;;  %v1600_v22 = vunpack.c.h.b16 %v4832_v27  ;;  %v4911_v8 = vunpack.i.l.s16 %v1592_v49  ;;  %v1221_v23 = vpack.c.b16 %v4882_v46, %v4882_v46  ;;  %v3979_v27 = vld [vmem:[%s5467_s3 + $0x220] sm:$0xff]  ;;  %v4985_v31 = vld [vmem:[#allocation2 + $0x18] sm:$0x88] }
  0xe7   :  { %v1642_v24 = vsel %vm794_vm6, %v1641_v3, %v1640_v21  ;;  %v1645_v25 = vrot.slane %v4879_v7, 5  ;;  %v1594_v28 = vunpack.c.h.b16 %v4756_v26  ;;  %v4918_v43 = vunpack.i.l.s16 %v1596_v9  ;;  %v4983_v46 = vld [vmem:[#allocation2] sm:$0x88]  ;;  %v4001_v21 = vld [vmem:[%s5467_s3 + $0x2d0] sm:$0xff] }
  0xe8   :  { %1762 = vmatpush.bf16.msra.mxu0 %v3981_v58  ;;  %1775 = vmatpush.bf16.msra.mxu1 %v3989_v40  ;;  %v4920_v15 = vunpack.i.l.s16 %v1598_v10  ;;  %v1647_v32 = vrot.slane %v4723_v50, 4  ;;  %v1648_v33 = vrot.slane %v4727_v11, 3  ;;  %v1222_v39 = vpack.c.b16 %v1220_v57, %v1220_v57  ;;  %v4991_v57 = vld [vmem:[#allocation2 + $0x10] sm:$0x88] }
  0xe9   :  { %1950 = vmatpush.bf16.msra.mxu2 %v3997_v55  ;;  %1963 = vmatpush.bf16.msra.mxu3 %v4005_v20  ;;  %v1409_v26 = vpack.c.b16 %v4896_v12, %v4896_v12  ;;  %v1644_v14 = vsel %vm797_vm7, %v1643_v47, %v1642_v24  ;;  %v1650_v17 = vrot.slane %v4899_v41, 2  ;;  %v4940_v35 = vunpack.i.l.s16 %v1600_v22  ;;  %v3985_v12 = vld [vmem:[%s5467_s3 + $0x250] sm:$0xff] }
  0xea   :  { %v1652_v51 = vrot.slane %v4911_v8, 1  ;;  %v1821_v48 = vrot.slane %v4624_v29, 5  ;;  %v1822_v53 = vrot.slane %v4633_v36, 4  ;;  %v1410_v52 = vpack.c.b16 %v1408_v19, %v1408_v19  ;;  %v3978_v29 = vld [vmem:[%s5467_s3 + $0x218] sm:$0xff]  ;;  %v3993_v19 = vld [vmem:[%s5467_s3 + $0x290] sm:$0xff] }
  0xeb   :  { %v4946_v54 = vsel %vm800_vm8, %v1645_v25, %v1644_v14  ;;  %v4948_v56 = vunpack.i.l.s16 %v1594_v28  ;;  %v1824_v38 = vrot.slane %v4765_v62, 3  ;;  %v1649_v58 = vsel %vm782_vm2, %v1648_v33, %v1647_v32  ;;  %v3986_v36 = vld [vmem:[%s5467_s3 + $0x258] sm:$0xff] }
  0xec   :  { %1763 = vmatpush.bf16.msra.mxu0 %v3980_v18  ;;  %1776 = vmatpush.bf16.msra.mxu1 %v3988_v60  ;;  %v1655_v40 = vrot.slane %v4918_v43, 7  ;;  %v1657_v16 = vrot.slane %v4920_v15, 6  ;;  %v1826_v34 = vrot.slane %v4781_v45, 2  ;;  %v1651_v62 = vsel %vm785_vm3, %v1650_v17, %v1649_v58  ;;  %v3994_v45 = vld [vmem:[%s5467_s3 + $0x298] sm:$0xff] }
  0xed   :  { %1951 = vmatpush.bf16.msra.mxu2 %v3996_v42  ;;  %1964 = vmatpush.bf16.msra.mxu3 %v4004_v13  ;;  %v1828_v0 = vrot.slane %v4783_v1, 1  ;;  %v1835_v55 = vrot.slane %v4723_v50, 5  ;;  %v1836_v20 = vrot.slane %v4727_v11, 4  ;;  %v1661_v2 = vpack.c.b16 %v4946_v54, %v4946_v54  ;;  %v4976_v11 = vld [vmem:[#allocation2 + $0x30] sm:$0x88] }
  0xee   :  { %v1653_v3 = vsel %vm788_vm4, %v1652_v51, %v1651_v62  ;;  %v1659_v1 = vrot.slane %v4940_v35, 5  ;;  %v1823_v50 = vsel %vm782_vm2, %v1822_v53, %v1821_v48  ;;  %v1831_v5 = vrot.slane %v4863_v61, 7  ;;  %v3977_v61 = vld [vmem:[%s5467_s3 + $0x210] sm:$0xff]  ;;  %v5003_v13 = vld [vmem:[#allocation2 + $0x8] sm:$0x88] }
  0xef   :  { %v1654_v49 = vsel %vm791_vm5, %v4948_v56, %v1653_v3  ;;  %v1825_v4 = vsel %vm785_vm3, %v1824_v38, %v1823_v50  ;;  %v1838_v6 = vrot.slane %v4899_v41, 3  ;;  %v1833_v18 = vrot.slane %v4879_v7, 6  ;;  %v3992_v48 = vld [vmem:[%s5467_s3 + $0x288] sm:$0xff] }
  0xf0   :  { %1764 = vmatpush.bf16.msra.mxu0 %v3979_v27  ;;  %1777 = vmatpush.bf16.msra.mxu1 %v3987_v37  ;;  %v1656_v9 = vsel %vm794_vm6, %v1655_v40, %v1654_v49  ;;  %v1827_v10 = vsel %vm788_vm4, %v1826_v34, %v1825_v4  ;;  %v1840_v60 = vrot.slane %v4911_v8, 2  ;;  %v1837_v7 = vsel %vm782_vm2, %v1836_v20, %v1835_v55  ;;  %v5014_v8 = vld [vmem:[#allocation2 + $0x20] sm:$0x88]  ;;  %v4000_v53 = vld [vmem:[%s5467_s3 + $0x2c8] sm:$0xff] }
  0xf1   :  { %1952 = vmatpush.bf16.msra.mxu2 %v3995_v30  ;;  %1965 = vmatpush.bf16.msra.mxu3 %v4003_v63  ;;  %v1658_v47 = vsel %vm797_vm7, %v1657_v16, %v1656_v9  ;;  %v1829_v41 = vsel %vm791_vm5, %v1828_v0, %v1827_v10  ;;  %v1842_v42 = vrot.slane %v4948_v56, 1  ;;  %v2027_v24 = vunpack.c.l.b16 %v4983_v46  ;;  %v3983_v20 = vld [vmem:[%s5467_s3 + $0x240] sm:$0xff]  ;;  %v4022_v9 = vld [vmem:[%s5467_s3 + $0x378] sm:$0xff] }
  0xf2   :  { %1329 = vmatmul.bf16.vlgmr.msrb.gmra.mxu0 %v1221_v23  ;;  %1342 = vmatmul.bf16.vlgmr.msrb.gmra.mxu1 %v1222_v39  ;;  %v5012_v22 = vsel %vm800_vm8, %v1659_v1, %v1658_v47  ;;  %v2025_v23 = vunpack.c.l.b16 %v4976_v11  ;;  %v2029_v25 = vunpack.c.l.b16 %v4985_v31  ;;  %v1830_v28 = vsel %vm794_vm6, %v4849_v44, %v1829_v41  ;;  %v3976_v44 = vld [vmem:[%s5467_s3 + $0x208] sm:$0xff]  ;;  %v3999_v49 = vld [vmem:[%s5467_s3 + $0x2c0] sm:$0xff] }
  0xf3   :  { %1517 = vmatmul.bf16.vlgmr.msrb.gmra.mxu2 %v1409_v26  ;;  %1530 = vmatmul.bf16.vlgmr.msrb.gmra.mxu3 %v1410_v52  ;;  %v1839_v32 = vsel %vm785_vm3, %v1838_v6, %v1837_v7  ;;  %v1845_v33 = vrot.slane %v4920_v15, 7  ;;  %v2031_v27 = vunpack.c.l.b16 %v4991_v57  ;;  %v1832_v37 = vsel %vm797_vm7, %v1831_v5, %v1830_v28  ;;  %v3984_v15 = vld [vmem:[%s5467_s3 + $0x248] sm:$0xff] }
  0xf4   :  { %1765 = vmatpush.bf16.msra.mxu0 %v3978_v29  ;;  %1778 = vmatpush.bf16.msra.mxu1 %v3986_v36  ;;  %v1841_v39 = vsel %vm788_vm4, %v1840_v60, %v1839_v32  ;;  %v1847_v26 = vrot.slane %v4940_v35, 6  ;;  %v2033_v14 = vunpack.c.l.b16 %v5003_v13  ;;  %v1662_v17 = vpack.c.b16 %v5012_v22, %v5012_v22  ;;  %v5040_v35 = vld [vmem:[#allocation2 + $0x28] sm:$0x88]  ;;  %v4013_v32 = vld [vmem:[%s5467_s3 + $0x330] sm:$0xff] }
  0xf5   :  { %1953 = vmatpush.bf16.msra.mxu2 %v3994_v45  ;;  %1966 = vmatpush.bf16.msra.mxu3 %v4002_v59  ;;  %v5037_v30 = vsel %vm800_vm8, %v1833_v18, %v1832_v37  ;;  %v1843_v63 = vsel %vm791_vm5, %v1842_v42, %v1841_v39  ;;  %v2035_v51 = vunpack.c.l.b16 %v5014_v8  ;;  %v5049_v52 = vunpack.i.l.s16 %v2025_v23  ;;  %v5074_v45 = vld [vmem:[#allocation2 + $0x38] sm:$0x88]  ;;  %v4020_v22 = vld [vmem:[%s5467_s3 + $0x368] sm:$0xff] }
  0xf6   :  { %v5051_v56 = vunpack.i.l.s16 %v2027_v24  ;;  %v5053_v38 = vunpack.i.l.s16 %v2029_v25  ;;  %v2026_v58 = vunpack.c.h.b16 %v4976_v11  ;;  %v1844_v40 = vsel %vm794_vm6, %v4918_v43, %v1843_v63  ;;  %v3975_v43 = vld [vmem:[%s5467_s3 + $0x200] sm:$0xff] }
  0xf7   :  { %v5058_v16 = vunpack.i.l.s16 %v2031_v27  ;;  %v2028_v34 = vunpack.c.h.b16 %v4983_v46  ;;  %v2030_v29 = vunpack.c.h.b16 %v4985_v31  ;;  %v1849_v36 = vpack.c.b16 %v5037_v30, %v5037_v30  ;;  %v3991_v11 = vld [vmem:[%s5467_s3 + $0x280] sm:$0xff]  ;;  %v4014_v31 = vld [vmem:[%s5467_s3 + $0x338] sm:$0xff] }
  0xf8   :  { %1766 = vmatpush.bf16.msra.mxu0 %v3977_v61  ;;  %1779 = vmatpush.bf16.msra.mxu1 %v3985_v12  ;;  %v1846_v62 = vsel %vm797_vm7, %v1845_v33, %v1844_v40  ;;  %v2037_v0 = vunpack.c.l.b16 %v5040_v35  ;;  %v5066_v55 = vunpack.i.l.s16 %v2033_v14  ;;  %v5076_v59 = vunpack.i.l.s16 %v2035_v51  ;;  %v4030_v61 = vld [vmem:[%s5467_s3 + $0x3b8] sm:$0xff]  ;;  %v4021_v33 = vld [vmem:[%s5467_s3 + $0x370] sm:$0xff] }
  0xf9   :  { %1954 = vmatpush.bf16.msra.mxu2 %v3993_v19  ;;  %1967 = vmatpush.bf16.msra.mxu3 %v4001_v21  ;;  %v2032_v3 = vunpack.c.h.b16 %v4991_v57  ;;  %v2034_v1 = vunpack.c.h.b16 %v5003_v13  ;;  %v2036_v50 = vunpack.c.h.b16 %v5014_v8  ;;  %v5087_v4 = vunpack.i.l.s16 %v2026_v58  ;;  %v4038_v12 = vld [vmem:[%s5467_s3 + $0x3f8] sm:$0xff] }
  0xfa   :  { %v2261_v5 = vrot.slane %v5049_v52, 7  ;;  %v2262_v6 = vrot.slane %v5051_v56, 6  ;;  %v2264_v46 = vrot.slane %v5053_v38, 5  ;;  %v5098_v10 = vunpack.i.l.s16 %v2037_v0 }
  0xfb   :  { %v5100_v18 = vunpack.i.l.s16 %v2028_v34  ;;  %v5102_v60 = vunpack.i.l.s16 %v2030_v29  ;;  %v2266_v57 = vrot.slane %v5058_v16, 4  ;;  %v1848_v47 = vsel %vm800_vm8, %v1847_v26, %v1846_v62  ;;  %v4028_v29 = vld [vmem:[%s5467_s3 + $0x3a8] sm:$0xff] }
  0xfc   :  { %1767 = vmatpush.bf16.msra.mxu0 %v3976_v44  ;;  %1780 = vmatpush.bf16.msra.mxu1 %v3984_v15  ;;  %v2039_v41 = vunpack.c.l.b16 %v5074_v45  ;;  %v2263_v7 = vsel %vm782_vm2, %v2262_v6, %v2261_v5  ;;  %v2268_v42 = vrot.slane %v5066_v55, 3  ;;  %v5115_v13 = vunpack.i.l.s16 %v2032_v3  ;;  %v4029_v44 = vld [vmem:[%s5467_s3 + $0x3b0] sm:$0xff]  ;;  %v4011_v3 = vld [vmem:[%s5467_s3 + $0x320] sm:$0xff]  ;;  %v4010_v6 = vld [vmem:[%s5467_s3 + $0x318] sm:$0xff] }
  0xfd   :  { %1955 = vmatpush.bf16.msra.mxu2 %v3992_v48  ;;  %1968 = vmatpush.bf16.msra.mxu3 %v4000_v53  ;;  %v5117_v19 = vunpack.i.l.s16 %v2034_v1  ;;  %v2265_v21 = vsel %vm785_vm3, %v2264_v46, %v2263_v7  ;;  %v2270_v8 = vrot.slane %v5076_v59, 2  ;;  %v2038_v24 = vunpack.c.h.b16 %v5040_v35  ;;  %v4037_v15 = vld [vmem:[%s5467_s3 + $0x3f0] sm:$0xff]  ;;  %v4019_v1 = vld [vmem:[%s5467_s3 + $0x360] sm:$0xff]  ;;  %v4018_v46 = vld [vmem:[%s5467_s3 + $0x358] sm:$0xff] }
  0xfe   :  { %v5121_v23 = vunpack.i.l.s16 %v2039_v41  ;;  %v5124_v25 = vunpack.i.l.s16 %v2036_v50  ;;  %v2275_v28 = vrot.slane %v5087_v4, 7  ;;  %v2267_v27 = vsel %vm788_vm4, %v2266_v57, %v2265_v21  ;;  %v4009_v57 = vld [vmem:[%s5467_s3 + $0x310] sm:$0xff] }
  0xff   :  { %v2272_v37 = vrot.slane %v5098_v10, 1  ;;  %v2276_v39 = vrot.slane %v5100_v18, 6  ;;  %v2278_v26 = vrot.slane %v5102_v60, 5  ;;  %v1850_v14 = vpack.c.b16 %v1848_v47, %v1848_v47  ;;  %v4033_v21 = vld [vmem:[%s5467_s3 + $0x3d0] sm:$0xff] }
 0x100   :  { %1768 = vmatpush.bf16.msra.mxu0 %v3975_v43  ;;  %1781 = vmatpush.bf16.msra.mxu1 %v3983_v20  ;;  %v2040_v63 = vunpack.c.h.b16 %v5074_v45  ;;  %v5144_v35 = vunpack.i.l.s16 %v2038_v24  ;;  %v2269_v51 = vsel %vm791_vm5, %v2268_v42, %v2267_v27  ;;  %v2280_v53 = vrot.slane %v5115_v13, 4  ;;  %v4025_v42 = vld [vmem:[%s5467_s3 + $0x390] sm:$0xff] }
 0x101   :  { %1956 = vmatpush.bf16.msra.mxu2 %v3991_v11  ;;  %1969 = vmatpush.bf16.msra.mxu3 %v3999_v49  ;;  %v2271_v48 = vsel %vm794_vm6, %v2270_v8, %v2269_v51  ;;  %v2282_v58 = vrot.slane %v5117_v19, 3  ;;  %v2277_v54 = vsel %vm782_vm2, %v2276_v39, %v2275_v28  ;;  %v2284_v34 = vrot.slane %v5124_v25, 2  ;;  %v4027_v11 = vld [vmem:[%s5467_s3 + $0x3a0] sm:$0xff]  ;;  %v4008_v28 = vld [vmem:[%s5467_s3 + $0x308] sm:$0xff] }
 0x102   :  { %v2273_v40 = vsel %vm797_vm7, %v2272_v37, %v2271_v48  ;;  %v2279_v30 = vsel %vm785_vm3, %v2278_v26, %v2277_v54  ;;  %v5179_v62 = vunpack.i.l.s16 %v2040_v63  ;;  %v2286_v43 = vrot.slane %v5144_v35, 1  ;;  %v4035_v49 = vld [vmem:[%s5467_s3 + $0x3e0] sm:$0xff] }
 0x103   :  { %1769 = vmatmul.bf16.vlgmr.msra.gmra.mxu0 %v1661_v2  ;;  %1782 = vmatmul.bf16.vlgmr.msra.gmra.mxu1 %v1662_v17  ;;  %v4012_v2 = vld [vmem:[%s5467_s3 + $0x328] sm:$0xff]  ;;  %v5169_v17 = vsel %vm800_vm8, %v5121_v23, %v2273_v40  ;;  %v2281_v0 = vsel %vm788_vm4, %v2280_v53, %v2279_v30  ;;  %v2074_v47 = vrot.slane %v5051_v56, 5  ;;  %v2087_v41 = vrot.slane %v5087_v4, 6  ;;  %v4023_v51 = vld [vmem:[%s5467_s3 + $0x380] sm:$0xff] }
 0x104   :  { %2201 = vmatpush.bf16.msrb.mxu0 %v4014_v31  ;;  %2214 = vmatpush.bf16.msrb.mxu1 %v4022_v9  ;;  %v2283_v20 = vsel %vm791_vm5, %v2282_v58, %v2281_v0  ;;  %v4026_v31 = vld [vmem:[%s5467_s3 + $0x398] sm:$0xff]  ;;  %v2088_v7 = vrot.slane %v5100_v18, 5  ;;  %v2076_v8 = vrot.slane %v5053_v38, 4  ;;  %v2078_v56 = vrot.slane %v5058_v16, 3  ;;  %v4016_v38 = vld [vmem:[%s5467_s3 + $0x348] sm:$0xff]  ;;  %v4031_v48 = vld [vmem:[%s5467_s3 + $0x3c0] sm:$0xff] }
 0x105   :  { %2389 = vmatpush.bf16.msrb.mxu2 %v4030_v61  ;;  %2402 = vmatpush.bf16.msrb.mxu3 %v4038_v12  ;;  %v2285_v45 = vsel %vm794_vm6, %v2284_v34, %v2283_v20  ;;  %v4034_v9 = vld [vmem:[%s5467_s3 + $0x3d8] sm:$0xff]  ;;  %v4017_v61 = vld [vmem:[%s5467_s3 + $0x350] sm:$0xff]  ;;  %v2073_v12 = vrot.slane %v5049_v52, 6  ;;  %v2090_v52 = vrot.slane %v5102_v60, 4  ;;  %v2092_v4 = vrot.slane %v5115_v13, 3 }
 0x106   :  { %1957 = vmatmul.bf16.vlgmr.msra.gmra.mxu2 %v1849_v36  ;;  %1970 = vmatmul.bf16.vlgmr.msra.gmra.mxu3 %v1850_v14  ;;  %v4036_v36 = vld [vmem:[%s5467_s3 + $0x3e8] sm:$0xff]  ;;  %v2287_v50 = vsel %vm797_vm7, %v2286_v43, %v2285_v45  ;;  %v2080_v18 = vrot.slane %v5066_v55, 2  ;;  %v2094_v24 = vrot.slane %v5117_v19, 2  ;;  %v2082_v16 = vrot.slane %v5076_v59, 1 }
 0x107   :  { %v5200_v5 = vsel %vm800_vm8, %v5179_v62, %v2287_v50  ;;  %v2075_v60 = vsel %vm782_vm2, %v2074_v47, %v2073_v12  ;;  %v2089_v13 = vsel %vm782_vm2, %v2088_v7, %v2087_v41  ;;  %v2096_v55 = vrot.slane %v5124_v25, 1  ;;  %v4024_v19 = vld [vmem:[%s5467_s3 + $0x388] sm:$0xff]  ;;  %v3833_v41 = vld [vmem:[%s5469_s5 + $0x40] sm:$0xf] }
 0x108   :  { %2202 = vmatpush.bf16.msrb.mxu0 %v4013_v32  ;;  %2215 = vmatpush.bf16.msrb.mxu1 %v4021_v33  ;;  %v4032_v32 = vld [vmem:[%s5467_s3 + $0x3c8] sm:$0xff]  ;;  %v2077_v33 = vsel %vm785_vm3, %v2076_v8, %v2075_v60  ;;  %v2091_v27 = vsel %vm785_vm3, %v2090_v52, %v2089_v13  ;;  %v2085_v37 = vrot.slane %v5121_v23, 7  ;;  %v2099_v39 = vrot.slane %v5179_v62, 7  ;;  %v4051_v7 = vld [vmem:[%s5469_s5 + $0x5c] sm:$0xf0] }
 0x109   :  { %2390 = vmatpush.bf16.msrb.mxu2 %v4029_v44  ;;  %2403 = vmatpush.bf16.msrb.mxu3 %v4037_v15  ;;  %v2079_v59 = vsel %vm788_vm4, %v2078_v56, %v2077_v33  ;;  %v2093_v25 = vsel %vm788_vm4, %v2092_v4, %v2091_v27  ;;  %v4007_v44 = vld [vmem:[%s5467_s3 + $0x300] sm:$0xff]  ;;  %v2289_v30 = vpack.c.b16 %v5169_v17, %v5169_v17  ;;  %v4048_v50 = vld [vmem:[%s5469_s5 + $0x4c] sm:$0xf] }
 0x10a   :  { %v2081_v26 = vsel %vm791_vm5, %v2080_v18, %v2079_v59  ;;  %v2095_v14 = vsel %vm791_vm5, %v2094_v24, %v2093_v25  ;;  %v4015_v15 = vld [vmem:[%s5467_s3 + $0x340] sm:$0xff]  ;;  %v2290_v34 = vpack.c.b16 %v5200_v5, %v5200_v5  ;;  %v4040_v60 = vld [vmem:[%s5469_s5 + $0xc] sm:$0xf]  ;;  %v3857_v25 = vld [vmem:[%s5469_s5 + $0x58] sm:$0xf] }
 0x10b   :  { %v2083_v23 = vsel %vm794_vm6, %v2082_v16, %v2081_v26  ;;  %v2097_v63 = vsel %vm794_vm6, %v2096_v55, %v2095_v14  ;;  %v3835_v8 = vld [vmem:[%s5469_s5 + $0x60] sm:$0xf0]  ;;  %v3811_v13 = vld [vmem:[%s5469_s5 + $0x28] sm:$0xf0]  ;;  %v3801_v55 = vld [vmem:[%s5469_s5] sm:$0xf] }
 0x10c   :  { %2203 = vmatpush.bf16.msrb.mxu0 %v4012_v2  ;;  %2216 = vmatpush.bf16.msrb.mxu1 %v4020_v22  ;;  %v2084_v53 = vsel %vm797_vm7, %v5098_v10, %v2083_v23  ;;  %v2098_v58 = vsel %vm797_vm7, %v5144_v35, %v2097_v63  ;;  %v4039_v27 = vld [vmem:[%s5469_s5 + $0x4] sm:$0xf]  ;;  %v4050_v26 = vld [vmem:[%s5469_s5 + $0x5c] sm:$0xf]  ;;  %v3849_v63 = vld [vmem:[%s5469_s5 + $0x50] sm:$0xf] }
 0x10d   :  { %2391 = vmatpush.bf16.msrb.mxu2 %v4028_v29  ;;  %2404 = vmatpush.bf16.msrb.mxu3 %v4036_v36  ;;  %v2086_v40 = vsel %vm800_vm8, %v2085_v37, %v2084_v53  ;;  %v2100_v54 = vsel %vm800_vm8, %v2099_v39, %v2098_v58  ;;  %v3803_v59 = vld [vmem:[%s5469_s5 + $0x20] sm:$0xf0]  ;;  %v4054_v39 = vld [vmem:[%s5469_s5 + $0x74] sm:$0xf0]  ;;  %v3859_v23 = vld [vmem:[%s5469_s5 + $0x78] sm:$0xf0] }
 0x10e   :  { %v2101_v2 = vpack.c.b16 %v2086_v40, %v2086_v40  ;;  %v2102_v22 = vpack.c.b16 %v2100_v54, %v2100_v54  ;;  %v3806_v37 = vor.u32 %v4039_v27, %v3803_v59  ;;  %v4049_v58 = vld [vmem:[%s5469_s5 + $0x54] sm:$0xf]  ;;  %v3825_v54 = vld [vmem:[%s5469_s5 + $0x18] sm:$0xf] }
 0x10f   :  { %v3851_v40 = vld [vmem:[%s5469_s5 + $0x70] sm:$0xf0] }
 0x110   :  { %2204 = vmatpush.bf16.msrb.mxu0 %v4011_v3  ;;  %2217 = vmatpush.bf16.msrb.mxu1 %v4019_v1  ;;  %v3841_v3 = vld [vmem:[%s5469_s5 + $0x48] sm:$0xf] }
 0x111   :  { %2392 = vmatpush.bf16.msrb.mxu2 %v4027_v11  ;;  %2405 = vmatpush.bf16.msrb.mxu3 %v4035_v49  ;;  %v4052_v1 = vld [vmem:[%s5469_s5 + $0x64] sm:$0xf0]  ;;  %v3843_v49 = vld [vmem:[%s5469_s5 + $0x68] sm:$0xf0] }
 0x112   :  { %v3842_v11 = vor.u32 %v4052_v1, %v3841_v3  ;;  %v3846_v5 = vor.u32 %v4048_v50, %v3843_v49  ;;  %v4041_v3 = vld [vmem:[%s5469_s5 + $0x14] sm:$0xf] }
 0x113   :  { %v3819_v50 = vld [vmem:[%s5469_s5 + $0x30] sm:$0xf0] }
 0x114   :  { %2205 = vmatpush.bf16.msrb.mxu0 %v4010_v6  ;;  %2218 = vmatpush.bf16.msrb.mxu1 %v4018_v46 }
 0x115   :  { %2393 = vmatpush.bf16.msrb.mxu2 %v4026_v31  ;;  %2406 = vmatpush.bf16.msrb.mxu3 %v4034_v9 }
 0x118   :  { %2206 = vmatpush.bf16.msrb.mxu0 %v4009_v57  ;;  %2219 = vmatpush.bf16.msrb.mxu1 %v4017_v61 }
 0x119   :  { %2394 = vmatpush.bf16.msrb.mxu2 %v4025_v42  ;;  %2407 = vmatpush.bf16.msrb.mxu3 %v4033_v21  ;;  %v4047_v42 = vld [vmem:[%s5469_s5 + $0x44] sm:$0xf]  ;;  %v3834_v21 = vor.u32 %v4051_v7, %v3833_v41 }
 0x11a   :  { %v3838_v52 = vor.u32 %v4047_v42, %v3835_v8 }
 0x11c   :  { %2207 = vmatpush.bf16.msrb.mxu0 %v4008_v28  ;;  %2220 = vmatpush.bf16.msrb.mxu1 %v4016_v38  ;;  %v3809_v28 = vld [vmem:[%s5469_s5 + $0x8] sm:$0xf] }
 0x11d   :  { %2395 = vmatpush.bf16.msrb.mxu2 %v4024_v19  ;;  %2408 = vmatpush.bf16.msrb.mxu3 %v4032_v32  ;;  %v4044_v38 = vld [vmem:[%s5469_s5 + $0x24] sm:$0xf0]  ;;  %v4043_v19 = vld [vmem:[%s5469_s5 + $0x1c] sm:$0xf0]  ;;  %v3814_v32 = vor.u32 %v4040_v60, %v3811_v13 }
 0x11e   :  { %v3810_v16 = vor.u32 %v4044_v38, %v3809_v28  ;;  %v3802_v33 = vor.u32 %v4043_v19, %v3801_v55 }
 0x120   :  { %2208 = vmatpush.bf16.msrb.mxu0 %v4007_v44  ;;  %2221 = vmatpush.bf16.msrb.mxu1 %v4015_v15  ;;  %v3858_v15 = vor.u32 %v4054_v39, %v3857_v25 }
 0x121   :  { %2396 = vmatpush.bf16.msrb.mxu2 %v4023_v51  ;;  %2409 = vmatpush.bf16.msrb.mxu3 %v4031_v48  ;;  %v4053_v51 = vld [vmem:[%s5469_s5 + $0x6c] sm:$0xf0]  ;;  %v3862_v48 = vor.u32 %v4050_v26, %v3859_v23 }
 0x122   :  { %v3850_v53 = vor.u32 %v4053_v51, %v3849_v63 }
 0x123   :  { %2209 = vmatmul.bf16.vlgmr.msrb.gmra.mxu0 %v2101_v2  ;;  %2222 = vmatmul.bf16.vlgmr.msrb.gmra.mxu1 %v2102_v22  ;;  %v3854_v2 = vor.u32 %v4049_v58, %v3851_v40  ;;  %v4046_v22 = vld [vmem:[%s5469_s5 + $0x34] sm:$0xf0] }
 0x124   :  { %2397 = vmatmul.bf16.vlgmr.msrb.gmra.mxu2 %v2289_v30  ;;  %2410 = vmatmul.bf16.vlgmr.msrb.gmra.mxu3 %v2290_v34  ;;  %v4042_v30 = vld [vmem:[%s5469_s5 + $0x1c] sm:$0xf] }
 0x125   :  { %2572 = vmatpush.bf16.msra.mxu2 %v3842_v11  ;;  %2585 = vmatpush.bf16.msra.mxu3 %v3846_v5  ;;  %v3827_v34 = vld [vmem:[%s5469_s5 + $0x38] sm:$0xf0]  ;;  %v3822_v11 = vor.u32 %v4041_v3, %v3819_v50 }
 0x126   :  { %2546 = vmatpush.bf16.msra.mxu0 %v3834_v21  ;;  %2559 = vmatpush.bf16.msra.mxu1 %v3838_v52 }
 0x129   :  { %2573 = vmatpush.bf16.msra.mxu2 %v3810_v16  ;;  %2586 = vmatpush.bf16.msra.mxu3 %v3814_v32 }
 0x12a   :  { %2547 = vmatpush.bf16.msra.mxu0 %v3802_v33  ;;  %2560 = vmatpush.bf16.msra.mxu1 %v3806_v37 }
 0x12d   :  { %2624 = vmatpush.bf16.msrb.mxu2 %v3858_v15  ;;  %2637 = vmatpush.bf16.msrb.mxu3 %v3862_v48 }
 0x12e   :  { %2598 = vmatpush.bf16.msrb.mxu0 %v3850_v53  ;;  %2611 = vmatpush.bf16.msrb.mxu1 %v3854_v2 }
 0x132   :  { %2612 = vmatpush.bf16.msrb.mxu1 %v3822_v11 }
 0x15f   :  { %v5284_v10 = vpop.f32.mrf.mxu0  ;;  %v5286_v35 = vpop.f32.mrf.mxu1 }
 0x160   :  { %v939_v49 = vadd.f32 %v5286_v35, %v5284_v10 }
 0x166   :  { %v5288_v29 = vpop.f32.mrf.mxu2  ;;  %v5290_v36 = vpop.f32.mrf.mxu3 }
 0x167   :  { %v927_v62 = vpop.f32.mrf.mxu0  ;;  %v940_v0 = vpop.f32.mrf.mxu1  ;;  %v1080_v5 = vadd.f32 %v5288_v29, %v939_v49 }
 0x168   :  { %v3826_v62 = vor.u32 %v4046_v22, %v3825_v54  ;;  %v3830_v0 = vor.u32 %v4042_v30, %v3827_v34 }
 0x16a   :  { %2625 = vmatpush.bf16.msrb.mxu2 %v3826_v62  ;;  %2638 = vmatpush.bf16.msrb.mxu3 %v3830_v0 }
 0x16e   :  { %v1081_v43 = vpop.f32.mrf.mxu2  ;;  %v1094_v20 = vpop.f32.mrf.mxu3 }
 0x16f   :  { %v5292_v17 = vpop.f32.mrf.mxu0  ;;  %v5294_v45 = vpop.f32.mrf.mxu1  ;;  %v3817_v43 = vld [vmem:[%s5469_s5 + $0x10] sm:$0xf] }
 0x170   :  { %v4045_v20 = vld [vmem:[%s5469_s5 + $0x2c] sm:$0xf0] }
 0x171   :  { %v3818_v1 = vor.u32 %v4045_v20, %v3817_v43 }
 0x173   :  { %2599 = vmatpush.bf16.msrb.mxu0 %v3818_v1 }
 0x176   :  { %v5308_v6 = vpop.f32.mrf.mxu2  ;;  %v5310_v46 = vpop.f32.mrf.mxu3 }
 0x177   :  { %v1332_v31 = vpop.f32.mrf.mxu0  ;;  %v1345_v9 = vpop.f32.mrf.mxu1 }
 0x178   :  { %v1344_v31 = vadd.f32 %v5294_v45, %v5292_v17  ;;  %v1093_v9 = vadd.f32 %v5290_v36, %v1080_v5 }
 0x17e   :  { %v1520_v57 = vpop.f32.mrf.mxu2  ;;  %v1533_v61 = vpop.f32.mrf.mxu3 }
 0x17f   :  { %v1532_v57 = vadd.f32 %v5310_v46, %v5308_v6  ;;  %v1347_v61 = vadd.f32 %v1344_v31, %v1093_v9  ;;  %v4060_v6 = vld [vmem:[%s5468_s4] ss:$0 sm:$0xff]  ;;  %s4120_s4 = smov [#allocation3]  }
 0x180   :  { %v5312_v12 = vpop.f32.mrf.mxu0  ;;  %v5314_v47 = vpop.f32.mrf.mxu1 }
 0x181   :  { %v1784_v41 = vadd.f32 %v5314_v47, %v5312_v12  ;;  %v1535_v35 = vadd.f32 %v1532_v57, %v1347_v61 }
 0x183   :  { %v1787_v29 = vadd.f32 %v1784_v41, %v1535_v35 }
 0x188   :  { %v1772_v18 = vpop.f32.mrf.mxu0  ;;  %v1785_v24 = vpop.f32.mrf.mxu1 }
 0x189   :  { %v5328_v56 = vpop.f32.mrf.mxu2  ;;  %v5330_v4 = vpop.f32.mrf.mxu3 }
 0x18a   :  { %v1972_v42 = vadd.f32 %v5330_v4, %v5328_v56  ;;  %v5422_v56 = vld [vmem:[%s5470_s6] sm:$0xff]  ;;  %s2809_s6 = sshll.u32 %s4120_s4, 4  ;;  %s2810_s6 = int_to_ptr.vmem [resolvable:$true] %s2809_s6 }
 0x18b   :  { %v2440_v4 = vperm.slane %v5422_v56, 0  ;;  %v2441_v60 = vperm.slane %v5422_v56, 1  ;;  %v2442_v27 = vperm.slane %v5422_v56, 2  ;;  %v2443_v59 = vperm.slane %v5422_v56, 3 }
 0x18c   :  { %v1975_v8 = vadd.f32 %v1972_v42, %v1787_v29  ;;  %v2444_v58 = vperm.slane %v5422_v56, 4  ;;  %v2445_v49 = vperm.slane %v5422_v56, 5 }
 0x191   :  { %v1960_v14 = vpop.f32.mrf.mxu2  ;;  %v1973_v44 = vpop.f32.mrf.mxu3 }
 0x1a0   :  { %v2210_v7 = vpop.f32.mrf.mxu0  ;;  %v2223_v10 = vpop.f32.mrf.mxu1 }
 0x1a1   :  { %v2224_v21 = vadd.f32 %v2223_v10, %v2210_v7 }
 0x1a3   :  { %v2227_v45 = vadd.f32 %v2224_v21, %v1975_v8 }
 0x1a7   :  { %v2398_v52 = vpop.f32.mrf.mxu2  ;;  %v2411_v17 = vpop.f32.mrf.mxu3 }
 0x1a8   :  { %v2412_v36 = vadd.f32 %v2411_v17, %v2398_v52  ;;  %v2212_v46 = vpop.f32.mrf.mxu0  ;;  %v2225_v18 = vpop.f32.mrf.mxu1  ;;  %v2446_v52 = vperm.slane %v5422_v56, 6 }
 0x1a9   :  { %v2447_v46 = vperm.slane %v5422_v56, 7 }
 0x1aa   :  { %v2415_v12 = vadd.f32 %v2412_v36, %v2227_v45 }
 0x1ac   :  { %v2420_v47 = vadd.f32 %v4060_v6, %v2415_v12 }
 0x1ae   :  { %v2421_v24 = vpack.c.bf16 %v2420_v47, %v2420_v47 }
 0x1af   :  { %v2400_v28 = vpop.f32.mrf.mxu2  ;;  %v2413_v38 = vpop.f32.mrf.mxu3 }
 0x1b0   :  { %3863 = vmatmul.msk.bf16.vlgmr.msra.gmra.mxu0 %vm2536_vm9, %v2421_v24  ;;  %3864 = vmatmul.msk.bf16.vlgmr.msra.gmra.mxu1 %vm2536_vm9, %v2421_v24 }
 0x1b1   :  { %3865 = vmatmul.msk.bf16.vlgmr.msra.gmra.mxu2 %vm2536_vm9, %v2421_v24  ;;  %3866 = vmatmul.msk.bf16.vlgmr.msra.gmra.mxu3 %vm2536_vm9, %v2421_v24 }
 0x1c0   :  { %3867 = vmatmul.msk.bf16.vlgmr.msrb.gmra.mxu0 %vm2536_vm9, %v2421_v24  ;;  %3868 = vmatmul.msk.bf16.vlgmr.msrb.gmra.mxu1 %vm2536_vm9, %v2421_v24 }
 0x1c1   :  { %3869 = vmatmul.msk.bf16.vlgmr.msrb.gmra.mxu2 %vm2536_vm9, %v2421_v24  ;;  %3870 = vmatmul.msk.bf16.vlgmr.msrb.gmra.mxu3 %vm2536_vm9, %v2421_v24 }
 0x22d   :  { %v2549_v16 = vpop.f32.mrf.mxu0  ;;  %v2562_v13 = vpop.f32.mrf.mxu1 }
 0x22e   :  { %v2550_v55 = vadd.f32 %v2549_v16, %v2440_v4  ;;  %v2563_v19 = vadd.f32 %v2562_v13, %v2441_v60 }
 0x230   :  { %v3871_v32 = vmul.f32 -1.442695, %v2550_v55  ;;  %v3872_v33 = vmul.f32 -1.442695, %v2563_v19 }
 0x232   :  { %4061 = vpow2.f32 %v3871_v32 }
 0x233   :  { %4063 = vpow2.f32 %v3872_v33 }
 0x234   :  { %v2575_v37 = vpop.f32.mrf.mxu2  ;;  %v2588_v25 = vpop.f32.mrf.mxu3 }
 0x235   :  { %v2576_v39 = vadd.f32 %v2575_v37, %v2442_v27  ;;  %v2589_v26 = vadd.f32 %v2588_v25, %v2443_v59  ;;  %v2551_v14 = vpop.f32.mrf.mxu0  ;;  %v2564_v44 = vpop.f32.mrf.mxu1 }
 0x237   :  { %v3873_v15 = vmul.f32 -1.442695, %v2576_v39  ;;  %v3874_v23 = vmul.f32 -1.442695, %v2589_v26 }
 0x238   :  { %v4062_v63 = vpop.eup %4061 }
 0x239   :  { %v4064_v51 = vpop.eup %4063  ;;  %v2668_v48 = vadd.f32 1.0, %v4062_v63  ;;  %4065 = vpow2.f32 %v3873_v15 }
 0x23a   :  { %v2669_v53 = vadd.f32 1.0, %v4064_v51  ;;  %4067 = vpow2.f32 %v3874_v23 }
 0x23b   :  { %4069 = vrcp.f32 %v2668_v48  ;;  %v2685_v20 = vand.u32 2147483647, %v2668_v48  ;;  %v2687_v5 = vand.u32 2147483648, %v2668_v48  ;;  %vm2681_vm10 = vweird.f32 %v2668_v48 }
 0x23c   :  { %4071 = vrcp.f32 %v2669_v53  ;;  %v2577_v40 = vpop.f32.mrf.mxu2  ;;  %v2590_v54 = vpop.f32.mrf.mxu3  ;;  %v2700_v57 = vand.u32 2147483647, %v2669_v53  ;;  %vm2696_vm12 = vweird.f32 %v2669_v53  ;;  %v2702_v10 = vand.u32 2147483648, %v2669_v53 }
 0x23d   :  { %v2601_v2 = vpop.f32.mrf.mxu0  ;;  %v2614_v0 = vpop.f32.mrf.mxu1  ;;  %vm5436_vm11 = vcmp.eq.f32.partialorder %v2685_v20, 8.507059e+37  ;;  %v2688_v21 = vor.u32 1.1754944e-38, %v2687_v5 }
 0x23e   :  { %v2602_v22 = vadd.f32 %v2601_v2, %v2444_v58  ;;  %v2615_v29 = vadd.f32 %v2614_v0, %v2445_v49  ;;  %vm5441_vm15 = vcmp.eq.f32.partialorder %v2700_v57, 8.507059e+37  ;;  %v2703_v24 = vor.u32 1.1754944e-38, %v2702_v10 }
 0x23f   :  { %v4066_v30 = vpop.eup %4065 }
 0x240   :  { %v4068_v34 = vpop.eup %4067  ;;  %v5429_v62 = vadd.f32 1.0, %v4066_v30  ;;  %v3875_v11 = vmul.f32 -1.442695, %v2602_v22  ;;  %v3876_v6 = vmul.f32 -1.442695, %v2615_v29 }
 0x241   :  { %v4070_v43 = vpop.eup %4069  ;;  %v5431_v3 = vadd.f32 1.0, %v4068_v34 }
 0x242   :  { %v4072_v1 = vpop.eup %4071  ;;  %v2677_v50 = vmul.f32 %v4070_v43, %v2668_v48  ;;  %4073 = vrcp.f32 %v5429_v62  ;;  %vm2682_vm13 = vweird.f32 %v4070_v43  ;;  %v2715_v16 = vand.u32 2147483647, %v5429_v62 }
 0x243   :  { %v2692_v31 = vmul.f32 %v4072_v1, %v2669_v53  ;;  %4075 = vrcp.f32 %v5431_v3  ;;  %vm2697_vm14 = vweird.f32 %v4072_v1  ;;  %vm2683_vm0 = vmor %vm2681_vm10, %vm2682_vm13  ;;  %v2717_v59 = vand.u32 2147483648, %v5429_v62 }
 0x244   :  { %v2678_v9 = vsub.f32 1.0, %v2677_v50  ;;  %v2627_v61 = vpop.f32.mrf.mxu2  ;;  %4077 = vpow2.f32 %v3875_v11  ;;  %v2640_v18 = vpop.f32.mrf.mxu3  ;;  %vm2698_vm1 = vmor %vm2696_vm12, %vm2697_vm14  ;;  %vm2711_vm3 = vweird.f32 %v5429_v62  ;;  %v2730_v15 = vand.u32 2147483647, %v5431_v3 }
 0x245   :  { %v2693_v7 = vsub.f32 1.0, %v2692_v31  ;;  %v2603_v35 = vpop.f32.mrf.mxu0  ;;  %v2616_v12 = vpop.f32.mrf.mxu1  ;;  %v2628_v38 = vadd.f32 %v2627_v61, %v2446_v52  ;;  %4079 = vpow2.f32 %v3876_v6  ;;  %v2641_v13 = vadd.f32 %v2640_v18, %v2447_v46 }
 0x246   :  { %v2679_v42 = vmul.f32 %v4070_v43, %v2678_v9  ;;  %v2732_v23 = vand.u32 2147483648, %v5431_v3  ;;  %v2718_v53 = vor.u32 1.1754944e-38, %v2717_v59  ;;  %vm2726_vm6 = vweird.f32 %v5431_v3 }
 0x247   :  { %v2694_v8 = vmul.f32 %v4072_v1, %v2693_v7  ;;  %v3877_v37 = vmul.f32 -1.442695, %v2628_v38  ;;  %v3878_v25 = vmul.f32 -1.442695, %v2641_v13  ;;  %vm2716_vm7 = vcmp.eq.f32.partialorder %v2715_v16, 8.507059e+37 }
 0x248   :  { %v4074_v17 = vpop.eup %4073  ;;  %v2680_v45 = vadd.f32 %v4070_v43, %v2679_v42  ;;  %v2733_v30 = vor.u32 1.1754944e-38, %v2732_v23  ;;  %vm2731_vm9 = vcmp.eq.f32.partialorder %v2730_v15, 8.507059e+37 }
 0x249   :  { %v2695_v47 = vadd.f32 %v4072_v1, %v2694_v8  ;;  %v2707_v28 = vmul.f32 %v4074_v17, %v5429_v62  ;;  %v4076_v4 = vpop.eup %4075  ;;  %vm2712_vm2 = vweird.f32 %v4074_v17  ;;  %4081 = vpow2.f32 %v3877_v37 }
 0x24a   :  { %v2684_v60 = vsel %vm2683_vm0, %v4070_v43, %v2680_v45  ;;  %v2722_v32 = vmul.f32 %v4076_v4, %v5431_v3  ;;  %v4078_v33 = vpop.eup %4077  ;;  %vm2727_vm4 = vweird.f32 %v4076_v4  ;;  %vm2713_vm5 = vmor %vm2711_vm3, %vm2712_vm2 }
 0x24b   :  { %v2689_v56 = vsel %vm5436_vm11, %v2688_v21, %v2684_v60  ;;  %v2699_v55 = vsel %vm2698_vm1, %v4072_v1, %v2695_v47  ;;  %v2708_v19 = vsub.f32 1.0, %v2707_v28  ;;  %v2672_v44 = vadd.f32 1.0, %v4078_v33  ;;  %v4080_v48 = vpop.eup %4079  ;;  %vm2728_vm8 = vmor %vm2726_vm6, %vm2727_vm4 }
 0x24c   :  { %2796 = vst [vmem:[#allocation3] sm:$0xff] %v2689_v56  ;;  %v2704_v27 = vsel %vm5441_vm15, %v2703_v24, %v2699_v55  ;;  %v2629_v39 = vpop.f32.mrf.mxu2  ;;  %v2723_v14 = vsub.f32 1.0, %v2722_v32  ;;  %v2642_v58 = vpop.f32.mrf.mxu3  ;;  %v2673_v2 = vadd.f32 1.0, %v4080_v48 }
 0x24d   :  { %2797 = vst [vmem:[#allocation3 + $0x8] sm:$0xff] %v2704_v27  ;;  %v2709_v26 = vmul.f32 %v4074_v17, %v2708_v19  ;;  %4083 = vrcp.f32 %v2672_v44  ;;  %v2745_v5 = vand.u32 2147483647, %v2672_v44  ;;  %v2747_v31 = vand.u32 2147483648, %v2672_v44 }
 0x24e   :  { %v2724_v51 = vmul.f32 %v4076_v4, %v2723_v14  ;;  %4085 = vpow2.f32 %v3878_v25  ;;  %vm2741_vm11 = vweird.f32 %v2672_v44  ;;  %v2760_v35 = vand.u32 2147483647, %v2673_v2 }
 0x24f   :  { %v2710_v63 = vadd.f32 %v4074_v17, %v2709_v26  ;;  %4087 = vrcp.f32 %v2673_v2  ;;  %v4082_v62 = vpop.eup %4081  ;;  %vm2746_vm13 = vcmp.eq.f32.partialorder %v2745_v5, 8.507059e+37  ;;  %v2748_v10 = vor.u32 1.1754944e-38, %v2747_v31 }
 0x250   :  { %v2725_v54 = vadd.f32 %v4076_v4, %v2724_v51  ;;  %v2674_v20 = vadd.f32 1.0, %v4082_v62  ;;  %v2762_v42 = vand.u32 2147483648, %v2673_v2  ;;  %vm2756_vm15 = vweird.f32 %v2673_v2 }
 0x251   :  { %v2714_v40 = vsel %vm2713_vm5, %v4074_v17, %v2710_v63  ;;  %vm2761_vm1 = vcmp.eq.f32.partialorder %v2760_v35, 8.507059e+37 }
 0x252   :  { %v2719_v22 = vsel %vm2716_vm7, %v2718_v53, %v2714_v40  ;;  %v2729_v34 = vsel %vm2728_vm8, %v4076_v4, %v2725_v54  ;;  %4089 = vrcp.f32 %v2674_v20  ;;  %v2763_v6 = vor.u32 1.1754944e-38, %v2762_v42 }
 0x253   :  { %2798 = vst [vmem:[#allocation3 + $0x10] sm:$0xff] %v2719_v22  ;;  %v2734_v0 = vsel %vm2731_vm9, %v2733_v30, %v2729_v34  ;;  %v4084_v43 = vpop.eup %4083  ;;  %v2777_v46 = vand.u32 2147483648, %v2674_v20  ;;  %v2775_v24 = vand.u32 2147483647, %v2674_v20  ;;  %vm2771_vm3 = vweird.f32 %v2674_v20 }
 0x254   :  { %2799 = vst [vmem:[#allocation3 + $0x18] sm:$0xff] %v2734_v0  ;;  %v4086_v1 = vpop.eup %4085  ;;  %v2737_v3 = vmul.f32 %v4084_v43, %v2672_v44  ;;  %vm2742_vm10 = vweird.f32 %v4084_v43 }
 0x255   :  { %v2675_v11 = vadd.f32 1.0, %v4086_v1  ;;  %v4088_v49 = vpop.eup %4087  ;;  %vm2743_vm12 = vmor %vm2741_vm11, %vm2742_vm10  ;;  %v2778_v16 = vor.u32 1.1754944e-38, %v2777_v46  ;;  %vm2776_vm6 = vcmp.eq.f32.partialorder %v2775_v24, 8.507059e+37 }
 0x256   :  { %v2738_v50 = vsub.f32 1.0, %v2737_v3  ;;  %v2752_v57 = vmul.f32 %v4088_v49, %v2673_v2  ;;  %vm2757_vm14 = vweird.f32 %v4088_v49 }
 0x257   :  { %4091 = vrcp.f32 %v2675_v11  ;;  %vm2758_vm0 = vmor %vm2756_vm15, %vm2757_vm14  ;;  %v2792_v60 = vand.u32 2147483648, %v2675_v11  ;;  %v2790_v56 = vand.u32 2147483647, %v2675_v11  ;;  %vm2786_vm7 = vweird.f32 %v2675_v11 }
 0x258   :  { %v2739_v9 = vmul.f32 %v4084_v43, %v2738_v50  ;;  %v2753_v41 = vsub.f32 1.0, %v2752_v57  ;;  %v4090_v7 = vpop.eup %4089 }
 0x259   :  { %v2767_v8 = vmul.f32 %v4090_v7, %v2674_v20  ;;  %vm2772_vm2 = vweird.f32 %v4090_v7  ;;  %v2793_v33 = vor.u32 1.1754944e-38, %v2792_v60  ;;  %vm2791_vm9 = vcmp.eq.f32.partialorder %v2790_v56, 8.507059e+37 }
 0x25a   :  { %v2740_v61 = vadd.f32 %v4084_v43, %v2739_v9  ;;  %v2754_v21 = vmul.f32 %v4088_v49, %v2753_v41  ;;  %vm2773_vm4 = vmor %vm2771_vm3, %vm2772_vm2 }
 0x25b   :  { %v2768_v36 = vsub.f32 1.0, %v2767_v8 }
 0x25c   :  { %v2744_v29 = vsel %vm2743_vm12, %v4084_v43, %v2740_v61  ;;  %v2755_v45 = vadd.f32 %v4088_v49, %v2754_v21 }
 0x25d   :  { %v2749_v52 = vsel %vm2746_vm13, %v2748_v10, %v2744_v29  ;;  %v4092_v17 = vpop.eup %4091  ;;  %v2769_v47 = vmul.f32 %v4090_v7, %v2768_v36 }
 0x25e   :  { %2800 = vst [vmem:[#allocation3 + $0x20] sm:$0xff] %v2749_v52  ;;  %v2782_v18 = vmul.f32 %v4092_v17, %v2675_v11  ;;  %v2759_v12 = vsel %vm2758_vm0, %v4088_v49, %v2755_v45  ;;  %vm2787_vm5 = vweird.f32 %v4092_v17 }
 0x25f   :  { %v2764_v28 = vsel %vm2761_vm1, %v2763_v6, %v2759_v12  ;;  %v2770_v4 = vadd.f32 %v4090_v7, %v2769_v47  ;;  %vm2788_vm8 = vmor %vm2786_vm7, %vm2787_vm5 }
 0x260   :  { %v2783_v38 = vsub.f32 1.0, %v2782_v18  ;;  %2801 = vst [vmem:[#allocation3 + $0x28] sm:$0xff] %v2764_v28 }
 0x261   :  { %v2774_v55 = vsel %vm2773_vm4, %v4090_v7, %v2770_v4 }
 0x262   :  { %v2784_v13 = vmul.f32 %v4092_v17, %v2783_v38  ;;  %v2779_v19 = vsel %vm2776_vm6, %v2778_v16, %v2774_v55 }
 0x263   :  { %2802 = vst [vmem:[#allocation3 + $0x30] sm:$0xff] %v2779_v19 }
 0x264   :  { %v2785_v32 = vadd.f32 %v4092_v17, %v2784_v13 }
 0x266   :  { %v2789_v27 = vsel %vm2788_vm8, %v4092_v17, %v2785_v32 }
 0x267   :  { %v2794_v59 = vsel %vm2791_vm9, %v2793_v33, %v2789_v27 }
 0x268   :  { %2803 = vst [vmem:[#allocation3 + $0x38] sm:$0xff] %v2794_v59 }
 0x269   :  { %2814 = dma.vmem_to_hbm [thread:$0]  %s2810_s6, 1024, %s2812_s29, [#allocation4]  }
 0x26a   :  { %4117 = dma.done.wait [#allocation4], 1024  }
 0x26b   :  { %4118 = vsyncadd [#allocation4], 4294966272 }
 0x26c   :  { %2819 = vsyncpa [#allocation4], 1 }

</bundles_post_ra>
